<compile_context>
chip_gen: v6e
topology: v6e:2x2x1
jax: 0.10.0
libtpu: 0.0.40
codegen_flags: <defaults>
</compile_context>

<pallas_src>
import functools

import jax
import jax.numpy as jnp
from jax.experimental import pallas as pl
from jax.experimental.pallas import tpu as pltpu

L_IN = 2048      # size[0]
D_HID = 128      # size[1]
D_ATT = 64       # size[2]  (attention hidden dim)
N_CLASSES = 2    # bag-level classifier classes


def _clam_sb_kernel(h_ref, wfc_ref, bfc_ref, wab_ref, bab_ref, wc_ref, bc_ref,
                    wcls_ref, bcls_ref,
                    a_raw_ref, m_out_ref, logits_ref,
                    m_scr, l_scr, acc_scr, *, n_valid):
    """One grid step = one tile of instances; online softmax + pooling."""
    i = pl.program_id(0)

    @pl.when(i == 0)
    def _init():
        m_scr[...] = jnp.full_like(m_scr, -jnp.inf)
        l_scr[...] = jnp.zeros_like(l_scr)
        acc_scr[...] = jnp.zeros_like(acc_scr)

    # fc: Linear(L_IN -> D_HID) + ReLU   (f32 accumulation even if h/Wfc are bf16)
    x = jnp.dot(h_ref[...], wfc_ref[...],
                preferred_element_type=jnp.float32) + bfc_ref[...]
    x = jnp.maximum(x, 0.0)                                   # (tile_n, 128)

    # Attn_Net_Gated with fused [Wa | Wb] weight: one 128-wide MXU matmul.
    y = jnp.dot(x, wab_ref[...],
                preferred_element_type=jnp.float32) + bab_ref[...]  # (tile_n, 128)
    a = jnp.tanh(y[:, :D_ATT])
    g = jax.nn.sigmoid(y[:, D_ATT:])
    ag = a * g                                                # (tile_n, 64)

    # Scores, produced lane-dense as a (1, tile_n) row:
    #   s[0, n] = sum_k wc[0, k] * ag[n, k] + bc
    s = jax.lax.dot_general(wc_ref[...], ag, (((1,), (1,)), ((), ())),
                            preferred_element_type=jnp.float32) + bc_ref[...]

    # Mask rows that are zero-padding beyond the true bag size N.
    col = jax.lax.broadcasted_iota(jnp.int32, s.shape, 1) + i * s.shape[1]
    s = jnp.where(col < n_valid, s, -jnp.inf)
    a_raw_ref[...] = s                                        # lane-dense store

    # Online softmax over instances + attention-weighted pooling accumulate.
    m_prev = m_scr[...]                                       # (1, 1)
    m_new = jnp.maximum(m_prev, jnp.max(s, axis=1, keepdims=True))
    alpha = jnp.exp(m_prev - m_new)                           # (1, 1)
    p = jnp.exp(s - m_new)                                    # (1, tile_n); 0 on padding
    l_scr[...] = alpha * l_scr[...] + jnp.sum(p, axis=1, keepdims=True)
    acc_scr[...] = alpha * acc_scr[...] + jnp.dot(
        p, x, preferred_element_type=jnp.float32)             # (1, 128)
    m_scr[...] = m_new

    @pl.when(i == pl.num_programs(0) - 1)
    def _finalize():
        inv_l = pl.reciprocal(l_scr[...], approx=True)        # EUP, off VPU path
        m_row = acc_scr[...] * inv_l                          # (1, 128) == M
        m_out_ref[...] = m_row
        logits_ref[...] = jnp.dot(m_row, wcls_ref[...],
                                  preferred_element_type=jnp.float32) + bcls_ref[...]


def clam_sb_forward(h, params, *, tile_n=256, use_bf16=False,
                    attention_only=False, return_features=False):
    """Returns (logits, Y_prob, Y_hat, A_raw, results_dict) like CLAM_SB.forward."""
    N = h.shape[0]
    assert N >= 1 and h.shape[1] == L_IN

    # Tile selection: big lane/sublane-friendly tiles; pad N instead of
    # falling back to a single full-N block.
    if N <= tile_n:
        tile_n = max(8, -(-N // 8) * 8)          # single tile, multiple of 8
    else:
        tile_n = -(-tile_n // 128) * 128         # multi-tile: multiple of 128
    n_pad = -(-N // tile_n) * tile_n
    grid = (n_pad // tile_n,)

    wfc, bfc = params["wfc"], params["bfc"]
    wab = jnp.concatenate([params["wa"], params["wb"]], axis=1)   # (128, 128)
    bab = jnp.concatenate([params["ba"], params["bb"]], axis=1)   # (1, 128)
    wc_row = params["wc"].T                                       # (1, 64)
    bc = params["bc"]                                             # (1, 1)
    wcls, bcls = params["wcls"], params["bcls"]                   # (128,2),(1,2)

    if use_bf16:
        # Halve HBM traffic of the dominant h stream; accumulation stays f32.
        h = h.astype(jnp.bfloat16)
        wfc = wfc.astype(jnp.bfloat16)

    if n_pad != N:
        h = jnp.pad(h, ((0, n_pad - N), (0, 0)))

    kernel = functools.partial(_clam_sb_kernel, n_valid=N)
    full = lambda shape: pl.BlockSpec(shape, lambda i: (0, 0))

    a_raw_pad, M, logits = pl.pallas_call(
        kernel,
        out_shape=(
            jax.ShapeDtypeStruct((1, n_pad), jnp.float32),        # A_raw (padded)
            jax.ShapeDtypeStruct((1, D_HID), jnp.float32),        # M
            jax.ShapeDtypeStruct((1, N_CLASSES), jnp.float32),    # logits
        ),
        grid_spec=pltpu.PrefetchScalarGridSpec(
            num_scalar_prefetch=0,
            grid=grid,
            in_specs=[
                pl.BlockSpec((tile_n, L_IN), lambda i: (i, 0)),   # h tile
                full((L_IN, D_HID)), full((1, D_HID)),            # fc
                full((D_HID, 2 * D_ATT)), full((1, 2 * D_ATT)),   # [Wa|Wb], [ba|bb]
                full((1, D_ATT)), full((1, 1)),                   # attention_c
                full((D_HID, N_CLASSES)), full((1, N_CLASSES)),   # classifiers
            ],
            out_specs=[
                pl.BlockSpec((1, tile_n), lambda i: (0, i)),      # lane-dense scores
                pl.BlockSpec((1, D_HID), lambda i: (0, 0)),       # M (last step)
                pl.BlockSpec((1, N_CLASSES), lambda i: (0, 0)),   # logits (last step)
            ],
            scratch_shapes=[
                pltpu.VMEM((1, 1), jnp.float32),       # running max
                pltpu.VMEM((1, 1), jnp.float32),       # running exp-sum
                pltpu.VMEM((1, D_HID), jnp.float32),   # running weighted feature sum
            ],
        ),
        # N-tile axis carries the online-softmax accumulator -> reduction axis.
        # TODO(synk): a two-pass split-N scheme could expose a parallel axis for
        # v7x's two TensorCores; single fused pass keeps it 'arbitrary'.
        compiler_params=pltpu.CompilerParams(
            dimension_semantics=("arbitrary",)),
    )(h, wfc, bfc, wab, bab, wc_row, bc, wcls, bcls)

    A_raw = a_raw_pad[:, :N]                                      # (1, N)
    if attention_only:
        return A_raw
    Y_prob = jax.nn.softmax(logits, axis=1)
    Y_hat = jnp.argmax(logits, axis=1, keepdims=True)
    results_dict = {}
    if return_features:
        results_dict["features"] = M
    # TODO(synk): instance_eval branch (label-dependent top-k instance selection +
    # CrossEntropy over instance_classifiers) is host-side control flow; not ported.
    return logits, Y_prob, Y_hat, A_raw, results_dict


# -------------------- Parameter init (deterministic, PyTorch-like) ----------
def init_params(key):
    def linear(key, fan_in, fan_out):
        k1, k2 = jax.random.split(key)
        bound = 1.0 / jnp.sqrt(fan_in)
        w = jax.random.uniform(k1, (fan_in, fan_out), jnp.float32, -bound, bound)
        b = jax.random.uniform(k2, (1, fan_out), jnp.float32, -bound, bound)
        return w, b

    keys = jax.random.split(key, 5)
    wfc, bfc = linear(keys[0], L_IN, D_HID)
    wa, ba = linear(keys[1], D_HID, D_ATT)
    wb, bb = linear(keys[2], D_HID, D_ATT)
    wc, bc = linear(keys[3], D_ATT, 1)
    wcls, bcls = linear(keys[4], D_HID, N_CLASSES)
    return dict(wfc=wfc, bfc=bfc, wa=wa, ba=ba, wb=wb, bb=bb, wc=wc, bc=bc,
                wcls=wcls, bcls=bcls)


# -------------------- Pure-JAX reference -------------------------------------
def reference_forward(h, p):
    x = jnp.maximum(h @ p["wfc"] + p["bfc"], 0.0)
    a = jnp.tanh(x @ p["wa"] + p["ba"])
    g = jax.nn.sigmoid(x @ p["wb"] + p["bb"])
    A = (a * g) @ p["wc"] + p["bc"]           # (N, 1)
    A_raw = A.T                                # (1, N)
    A_sm = jax.nn.softmax(A_raw, axis=1)
    M = A_sm @ x                               # (1, 128)
    logits = M @ p["wcls"] + p["bcls"]         # (1, 2)
    Y_prob = jax.nn.softmax(logits, axis=1)
    Y_hat = jnp.argmax(logits, axis=1, keepdims=True)
    return logits, Y_prob, Y_hat, A_raw, M


if __name__ == "__main__":
    key = jax.random.PRNGKey(0)
    k_param, k_data = jax.random.split(key)
    params = init_params(k_param)

    # Two bag sizes: one small (single clamped tile) and one that exercises the
    # multi-tile online-softmax path with zero-padding/masking (300 -> 2 tiles).
    for N in (64, 300):
        h = jax.random.normal(jax.random.fold_in(k_data, N), (N, L_IN), jnp.float32)

        logits, Y_prob, Y_hat, A_raw, _ = clam_sb_forward(h, params)
        logits, Y_prob, Y_hat, A_raw = jax.block_until_ready(
            (logits, Y_prob, Y_hat, A_raw))

        l_ref, p_ref, y_ref, a_ref, m_ref = reference_forward(h, params)

        assert A_raw.shape == (1, N)
        assert logits.shape == (1, N_CLASSES)
        assert Y_hat.shape == (1, 1)
        # A_raw has no approximate ops -> tight tolerance.
        assert jnp.allclose(A_raw, a_ref, atol=1e-4, rtol=1e-3), "A_raw mismatch"
        # M/logits go through the approximate EUP reciprocal -> slightly looser.
        assert jnp.allclose(logits, l_ref, atol=5e-3, rtol=5e-3), "logits mismatch"
        assert jnp.allclose(Y_prob, p_ref, atol=5e-3, rtol=5e-3), "Y_prob mismatch"

    print("KERNEL_OK")
</pallas_src>

<mosaic_0001>
module attributes {stable_mosaic.version = 11 : i64} {
  func.func @_clam_sb_kernel(%arg0: i32, %arg1: memref<64x2048xf32, #tpu.memory_space<vmem>>, %arg2: memref<2048x128xf32, #tpu.memory_space<vmem>>, %arg3: memref<1x128xf32, #tpu.memory_space<vmem>>, %arg4: memref<128x128xf32, #tpu.memory_space<vmem>>, %arg5: memref<1x128xf32, #tpu.memory_space<vmem>>, %arg6: memref<1x64xf32, #tpu.memory_space<vmem>>, %arg7: memref<1x1xf32, #tpu.memory_space<vmem>>, %arg8: memref<128x2xf32, #tpu.memory_space<vmem>>, %arg9: memref<1x2xf32, #tpu.memory_space<vmem>>, %arg10: memref<1x64xf32, #tpu.memory_space<vmem>>, %arg11: memref<1x128xf32, #tpu.memory_space<vmem>>, %arg12: memref<1x2xf32, #tpu.memory_space<vmem>>, %arg13: memref<1x1xf32, #tpu.memory_space<vmem>>, %arg14: memref<1x1xf32, #tpu.memory_space<vmem>>, %arg15: memref<1x128xf32, #tpu.memory_space<vmem>>) attributes {dimension_semantics = [#tpu.dimension_semantics<arbitrary>], iteration_bounds = array<i64: 1>, scalar_prefetch = 0 : i64, scratch_operands = 3 : i64, tpu.core_type = #tpu.core_type<tc>, window_params = [{transform_indices = @transform_0, window_bounds = array<i64: 64, 2048>}, {pipeline_mode = #tpu.pipeline_mode<synchronous>, transform_indices = @transform_1, window_bounds = array<i64: 2048, 128>}, {pipeline_mode = #tpu.pipeline_mode<synchronous>, transform_indices = @transform_2, window_bounds = array<i64: 1, 128>}, {pipeline_mode = #tpu.pipeline_mode<synchronous>, transform_indices = @transform_3, window_bounds = array<i64: 128, 128>}, {pipeline_mode = #tpu.pipeline_mode<synchronous>, transform_indices = @transform_4, window_bounds = array<i64: 1, 128>}, {pipeline_mode = #tpu.pipeline_mode<synchronous>, transform_indices = @transform_5, window_bounds = array<i64: 1, 64>}, {pipeline_mode = #tpu.pipeline_mode<synchronous>, transform_indices = @transform_6, window_bounds = array<i64: 1, 1>}, {pipeline_mode = #tpu.pipeline_mode<synchronous>, transform_indices = @transform_7, window_bounds = array<i64: 128, 2>}, {pipeline_mode = #tpu.pipeline_mode<synchronous>, transform_indices = @transform_8, window_bounds = array<i64: 1, 2>}, {transform_indices = @transform_9, window_bounds = array<i64: 1, 64>}, {pipeline_mode = #tpu.pipeline_mode<synchronous>, transform_indices = @transform_10, window_bounds = array<i64: 1, 128>}, {pipeline_mode = #tpu.pipeline_mode<synchronous>, transform_indices = @transform_11, window_bounds = array<i64: 1, 2>}]} {
    %c0_i32 = arith.constant 0 : i32
    %0 = arith.cmpi eq, %arg0, %c0_i32 : i32
    %1 = arith.extui %0 : i1 to i32
    %c0_i32_0 = arith.constant 0 : i32
    %2 = arith.cmpi ne, %1, %c0_i32_0 : i32
    scf.if %2 {
      %cst_39 = arith.constant 0xFF800000 : f32
      %64 = vector.broadcast %cst_39 : f32 to vector<1x1xf32>
      %c0_40 = arith.constant 0 : index
      %c0_41 = arith.constant 0 : index
      %65 = vector.load %arg13[%c0_40, %c0_41] : memref<1x1xf32, #tpu.memory_space<vmem>>, vector<1x1xf32>
      tpu.vector_store %arg13[%c0_40, %c0_41], %64 {strides = array<i32>} : memref<1x1xf32, #tpu.memory_space<vmem>>, vector<1x1xf32>,
      %cst_42 = arith.constant 0.000000e+00 : f32
      %66 = vector.broadcast %cst_42 : f32 to vector<1x1xf32>
      %c0_43 = arith.constant 0 : index
      %c0_44 = arith.constant 0 : index
      %67 = vector.load %arg14[%c0_43, %c0_44] : memref<1x1xf32, #tpu.memory_space<vmem>>, vector<1x1xf32>
      tpu.vector_store %arg14[%c0_43, %c0_44], %66 {strides = array<i32>} : memref<1x1xf32, #tpu.memory_space<vmem>>, vector<1x1xf32>,
      %cst_45 = arith.constant 0.000000e+00 : f32
      %68 = vector.broadcast %cst_45 : f32 to vector<1x128xf32>
      %c0_46 = arith.constant 0 : index
      %c0_47 = arith.constant 0 : index
      %69 = vector.load %arg15[%c0_46, %c0_47] : memref<1x128xf32, #tpu.memory_space<vmem>>, vector<1x128xf32>
      tpu.vector_store %arg15[%c0_46, %c0_47], %68 {strides = array<i32>} : memref<1x128xf32, #tpu.memory_space<vmem>>, vector<1x128xf32>,
    } else {
    }
    %c0 = arith.constant 0 : index
    %c0_1 = arith.constant 0 : index
    %3 = vector.load %arg1[%c0, %c0_1] : memref<64x2048xf32, #tpu.memory_space<vmem>>, vector<64x2048xf32>
    %c0_2 = arith.constant 0 : index
    %c0_3 = arith.constant 0 : index
    %4 = vector.load %arg2[%c0_2, %c0_3] : memref<2048x128xf32, #tpu.memory_space<vmem>>, vector<2048x128xf32>
    %cst = arith.constant dense<0.000000e+00> : vector<64x128xf32>
    %5 = tpu.matmul %3, %4, %cst {dimension_numbers = #tpu.dot_dimension_numbers<[1], [0], [0], [1], [0, 0, 1, 1], [], []>} : vector<64x2048xf32>, vector<2048x128xf32>, vector<64x128xf32> -> vector<64x128xf32>
    %c0_4 = arith.constant 0 : index
    %c0_5 = arith.constant 0 : index
    %6 = vector.load %arg3[%c0_4, %c0_5] : memref<1x128xf32, #tpu.memory_space<vmem>>, vector<1x128xf32>
    %7 = vector.broadcast %6 : vector<1x128xf32> to vector<64x128xf32>
    %8 = arith.addf %5, %7 : vector<64x128xf32>
    %cst_6 = arith.constant 0.000000e+00 : f32
    %9 = vector.broadcast %cst_6 : f32 to vector<64x128xf32>
    %10 = arith.maximumf %8, %9 : vector<64x128xf32>
    %c0_7 = arith.constant 0 : index
    %c0_8 = arith.constant 0 : index
    %11 = vector.load %arg4[%c0_7, %c0_8] : memref<128x128xf32, #tpu.memory_space<vmem>>, vector<128x128xf32>
    %cst_9 = arith.constant dense<0.000000e+00> : vector<64x128xf32>
    %12 = tpu.matmul %10, %11, %cst_9 {dimension_numbers = #tpu.dot_dimension_numbers<[1], [0], [0], [1], [0, 0, 1, 1], [], []>} : vector<64x128xf32>, vector<128x128xf32>, vector<64x128xf32> -> vector<64x128xf32>
    %c0_10 = arith.constant 0 : index
    %c0_11 = arith.constant 0 : index
    %13 = vector.load %arg5[%c0_10, %c0_11] : memref<1x128xf32, #tpu.memory_space<vmem>>, vector<1x128xf32>
    %14 = vector.broadcast %13 : vector<1x128xf32> to vector<64x128xf32>
    %15 = arith.addf %12, %14 : vector<64x128xf32>
    %16 = vector.extract_strided_slice %15 {offsets = [0, 0], sizes = [64, 64], strides = [1, 1]} : vector<64x128xf32> to vector<64x64xf32>
    %17 = math.tanh %16 : vector<64x64xf32>
    %18 = vector.extract_strided_slice %15 {offsets = [0, 64], sizes = [64, 64], strides = [1, 1]} : vector<64x128xf32> to vector<64x64xf32>
    %19 = arith.negf %18 : vector<64x64xf32>
    %20 = math.exp %19 : vector<64x64xf32>
    %cst_12 = arith.constant 1.000000e+00 : f32
    %21 = vector.broadcast %cst_12 : f32 to vector<64x64xf32>
    %22 = arith.addf %21, %20 : vector<64x64xf32>
    %23 = arith.divf %21, %22 : vector<64x64xf32>
    %24 = arith.mulf %17, %23 : vector<64x64xf32>
    %c0_13 = arith.constant 0 : index
    %c0_14 = arith.constant 0 : index
    %25 = vector.load %arg6[%c0_13, %c0_14] : memref<1x64xf32, #tpu.memory_space<vmem>>, vector<1x64xf32>
    %cst_15 = arith.constant dense<0.000000e+00> : vector<1x64xf32>
    %26 = tpu.matmul %25, %24, %cst_15 {dimension_numbers = #tpu.dot_dimension_numbers<[1], [1], [0], [0], [0, 0, 1, 0], [], []>} : vector<1x64xf32>, vector<64x64xf32>, vector<1x64xf32> -> vector<1x64xf32>
    %c0_16 = arith.constant 0 : index
    %c0_17 = arith.constant 0 : index
    %27 = vector.load %arg7[%c0_16, %c0_17] : memref<1x1xf32, #tpu.memory_space<vmem>>, vector<1x1xf32>
    %28 = vector.broadcast %27 : vector<1x1xf32> to vector<1x64xf32>
    %29 = arith.addf %26, %28 : vector<1x64xf32>
    %30 = tpu.iota {dimensions = array<i32: 1>} : vector<1x64xi32>
    %c64_i32 = arith.constant 64 : i32
    %31 = arith.muli %arg0, %c64_i32 : i32
    %32 = vector.broadcast %31 : i32 to vector<1x64xi32>
    %33 = arith.addi %30, %32 : vector<1x64xi32>
    %c64_i32_18 = arith.constant 64 : i32
    %34 = vector.broadcast %c64_i32_18 : i32 to vector<1x64xi32>
    %35 = arith.cmpi slt, %33, %34 : vector<1x64xi32>
    %cst_19 = arith.constant 0xFF800000 : f32
    %36 = vector.broadcast %cst_19 : f32 to vector<1x64xf32>
    %37 = arith.select %35, %29, %36 : vector<1x64xi1>, vector<1x64xf32>
    %c0_20 = arith.constant 0 : index
    %c0_21 = arith.constant 0 : index
    %38 = vector.load %arg10[%c0_20, %c0_21] : memref<1x64xf32, #tpu.memory_space<vmem>>, vector<1x64xf32>
    tpu.vector_store %arg10[%c0_20, %c0_21], %37 {strides = array<i32>} : memref<1x64xf32, #tpu.memory_space<vmem>>, vector<1x64xf32>,
    %c0_22 = arith.constant 0 : index
    %c0_23 = arith.constant 0 : index
    %39 = vector.load %arg13[%c0_22, %c0_23] : memref<1x1xf32, #tpu.memory_space<vmem>>, vector<1x1xf32>
    %cst_24 = arith.constant dense<0xFF800000> : vector<1xf32>
    %40 = vector.multi_reduction <maximumf>, %37, %cst_24 [1] : vector<1x64xf32> to vector<1xf32>
    %41 = vector.shape_cast %40 : vector<1xf32> to vector<1x1xf32>
    %42 = arith.maximumf %39, %41 : vector<1x1xf32>
    %43 = arith.subf %39, %42 : vector<1x1xf32>
    %44 = math.exp %43 : vector<1x1xf32>
    %45 = vector.broadcast %42 : vector<1x1xf32> to vector<1x64xf32>
    %46 = arith.subf %37, %45 : vector<1x64xf32>
    %47 = math.exp %46 : vector<1x64xf32>
    %c0_25 = arith.constant 0 : index
    %c0_26 = arith.constant 0 : index
    %48 = vector.load %arg14[%c0_25, %c0_26] : memref<1x1xf32, #tpu.memory_space<vmem>>, vector<1x1xf32>
    %49 = arith.mulf %44, %48 : vector<1x1xf32>
    %cst_27 = arith.constant dense<0.000000e+00> : vector<1xf32>
    %50 = vector.multi_reduction <add>, %47, %cst_27 [1] : vector<1x64xf32> to vector<1xf32>
    %51 = vector.shape_cast %50 : vector<1xf32> to vector<1x1xf32>
    %52 = arith.addf %49, %51 : vector<1x1xf32>
    %c0_28 = arith.constant 0 : index
    %c0_29 = arith.constant 0 : index
    %53 = vector.load %arg14[%c0_28, %c0_29] : memref<1x1xf32, #tpu.memory_space<vmem>>, vector<1x1xf32>
    tpu.vector_store %arg14[%c0_28, %c0_29], %52 {strides = array<i32>} : memref<1x1xf32, #tpu.memory_space<vmem>>, vector<1x1xf32>,
    %c0_30 = arith.constant 0 : index
    %c0_31 = arith.constant 0 : index
    %54 = vector.load %arg15[%c0_30, %c0_31] : memref<1x128xf32, #tpu.memory_space<vmem>>, vector<1x128xf32>
    %55 = vector.broadcast %44 : vector<1x1xf32> to vector<1x128xf32>
    %56 = arith.mulf %55, %54 : vector<1x128xf32>
    %cst_32 = arith.constant dense<0.000000e+00> : vector<1x128xf32>
    %57 = tpu.matmul %47, %10, %cst_32 {dimension_numbers = #tpu.dot_dimension_numbers<[1], [0], [0], [1], [0, 0, 1, 1], [], []>} : vector<1x64xf32>, vector<64x128xf32>, vector<1x128xf32> -> vector<1x128xf32>
    %58 = arith.addf %56, %57 : vector<1x128xf32>
    %c0_33 = arith.constant 0 : index
    %c0_34 = arith.constant 0 : index
    %59 = vector.load %arg15[%c0_33, %c0_34] : memref<1x128xf32, #tpu.memory_space<vmem>>, vector<1x128xf32>
    tpu.vector_store %arg15[%c0_33, %c0_34], %58 {strides = array<i32>} : memref<1x128xf32, #tpu.memory_space<vmem>>, vector<1x128xf32>,
    %c0_35 = arith.constant 0 : index
    %c0_36 = arith.constant 0 : index
    %60 = vector.load %arg13[%c0_35, %c0_36] : memref<1x1xf32, #tpu.memory_space<vmem>>, vector<1x1xf32>
    tpu.vector_store %arg13[%c0_35, %c0_36], %42 {strides = array<i32>} : memref<1x1xf32, #tpu.memory_space<vmem>>, vector<1x1xf32>,
    %c0_i32_37 = arith.constant 0 : i32
    %61 = arith.cmpi eq, %arg0, %c0_i32_37 : i32
    %62 = arith.extui %61 : i1 to i32
    %c0_i32_38 = arith.constant 0 : i32
    %63 = arith.cmpi ne, %62, %c0_i32_38 : i32
    scf.if %63 {
      %c0_39 = arith.constant 0 : index
      %c0_40 = arith.constant 0 : index
      %64 = vector.load %arg14[%c0_39, %c0_40] : memref<1x1xf32, #tpu.memory_space<vmem>>, vector<1x1xf32>
      %65 = tpu.reciprocal %64 {approx = true} : vector<1x1xf32> -> vector<1x1xf32>
      %c0_41 = arith.constant 0 : index
      %c0_42 = arith.constant 0 : index
      %66 = vector.load %arg15[%c0_41, %c0_42] : memref<1x128xf32, #tpu.memory_space<vmem>>, vector<1x128xf32>
      %67 = vector.broadcast %65 : vector<1x1xf32> to vector<1x128xf32>
      %68 = arith.mulf %66, %67 : vector<1x128xf32>
      %c0_43 = arith.constant 0 : index
      %c0_44 = arith.constant 0 : index
      %69 = vector.load %arg11[%c0_43, %c0_44] : memref<1x128xf32, #tpu.memory_space<vmem>>, vector<1x128xf32>
      tpu.vector_store %arg11[%c0_43, %c0_44], %68 {strides = array<i32>} : memref<1x128xf32, #tpu.memory_space<vmem>>, vector<1x128xf32>,
      %c0_45 = arith.constant 0 : index
      %c0_46 = arith.constant 0 : index
      %70 = vector.load %arg8[%c0_45, %c0_46] : memref<128x2xf32, #tpu.memory_space<vmem>>, vector<128x2xf32>
      %cst_47 = arith.constant dense<0.000000e+00> : vector<1x2xf32>
      %71 = tpu.matmul %68, %70, %cst_47 {dimension_numbers = #tpu.dot_dimension_numbers<[1], [0], [0], [1], [0, 0, 1, 1], [], []>} : vector<1x128xf32>, vector<128x2xf32>, vector<1x2xf32> -> vector<1x2xf32>
      %c0_48 = arith.constant 0 : index
      %c0_49 = arith.constant 0 : index
      %72 = vector.load %arg9[%c0_48, %c0_49] : memref<1x2xf32, #tpu.memory_space<vmem>>, vector<1x2xf32>
      %73 = arith.addf %71, %72 : vector<1x2xf32>
      %c0_50 = arith.constant 0 : index
      %c0_51 = arith.constant 0 : index
      %74 = vector.load %arg12[%c0_50, %c0_51] : memref<1x2xf32, #tpu.memory_space<vmem>>, vector<1x2xf32>
      tpu.vector_store %arg12[%c0_50, %c0_51], %73 {strides = array<i32>} : memref<1x2xf32, #tpu.memory_space<vmem>>, vector<1x2xf32>,
    } else {
    }
    return
  }
  func.func @transform_0(%arg0: i32) -> (i32, i32) {
    %c0_i32 = arith.constant 0 : i32
    %c0_i32_0 = arith.constant 0 : i32
    return %arg0, %c0_i32 : i32, i32
  }
  func.func @transform_1(%arg0: i32) -> (i32, i32) {
    %c0_i32 = arith.constant 0 : i32
    %c0_i32_0 = arith.constant 0 : i32
    %c0_i32_1 = arith.constant 0 : i32
    return %c0_i32, %c0_i32_0 : i32, i32
  }
  func.func @transform_2(%arg0: i32) -> (i32, i32) {
    %c0_i32 = arith.constant 0 : i32
    %c0_i32_0 = arith.constant 0 : i32
    %c0_i32_1 = arith.constant 0 : i32
    return %c0_i32, %c0_i32_0 : i32, i32
  }
  func.func @transform_3(%arg0: i32) -> (i32, i32) {
    %c0_i32 = arith.constant 0 : i32
    %c0_i32_0 = arith.constant 0 : i32
    %c0_i32_1 = arith.constant 0 : i32
    return %c0_i32, %c0_i32_0 : i32, i32
  }
  func.func @transform_4(%arg0: i32) -> (i32, i32) {
    %c0_i32 = arith.constant 0 : i32
    %c0_i32_0 = arith.constant 0 : i32
    %c0_i32_1 = arith.constant 0 : i32
    return %c0_i32, %c0_i32_0 : i32, i32
  }
  func.func @transform_5(%arg0: i32) -> (i32, i32) {
    %c0_i32 = arith.constant 0 : i32
    %c0_i32_0 = arith.constant 0 : i32
    %c0_i32_1 = arith.constant 0 : i32
    return %c0_i32, %c0_i32_0 : i32, i32
  }
  func.func @transform_6(%arg0: i32) -> (i32, i32) {
    %c0_i32 = arith.constant 0 : i32
    %c0_i32_0 = arith.constant 0 : i32
    %c0_i32_1 = arith.constant 0 : i32
    return %c0_i32, %c0_i32_0 : i32, i32
  }
  func.func @transform_7(%arg0: i32) -> (i32, i32) {
    %c0_i32 = arith.constant 0 : i32
    %c0_i32_0 = arith.constant 0 : i32
    %c0_i32_1 = arith.constant 0 : i32
    return %c0_i32, %c0_i32_0 : i32, i32
  }
  func.func @transform_8(%arg0: i32) -> (i32, i32) {
    %c0_i32 = arith.constant 0 : i32
    %c0_i32_0 = arith.constant 0 : i32
    %c0_i32_1 = arith.constant 0 : i32
    return %c0_i32, %c0_i32_0 : i32, i32
  }
  func.func @transform_9(%arg0: i32) -> (i32, i32) {
    %c0_i32 = arith.constant 0 : i32
    %c0_i32_0 = arith.constant 0 : i32
    return %c0_i32, %arg0 : i32, i32
  }
  func.func @transform_10(%arg0: i32) -> (i32, i32) {
    %c0_i32 = arith.constant 0 : i32
    %c0_i32_0 = arith.constant 0 : i32
    %c0_i32_1 = arith.constant 0 : i32
    return %c0_i32, %c0_i32_0 : i32, i32
  }
  func.func @transform_11(%arg0: i32) -> (i32, i32) {
    %c0_i32 = arith.constant 0 : i32
    %c0_i32_0 = arith.constant 0 : i32
    %c0_i32_1 = arith.constant 0 : i32
    return %c0_i32, %c0_i32_0 : i32, i32
  }
}

</mosaic_0001>

<bundles_post_ra>
// kernel: tpu_custom_call.1
= control target key start
LH: loop header
LB: loop body
LE: loop exit
PB: predicated region body
PF: predicated region fallthrough
CT: control target
= control target key end

     0   :  { %s3223_s0 = inlined_call_operand.hbm [shape: f32[64,2048], index: 0, kind: input, shape index: {}]   ;;  %s3224_s1 = inlined_call_operand.hbm [shape: f32[2048,128], index: 1, kind: input, shape index: {}]   ;;  %s3225_s2 = inlined_call_operand.vmem [shape: f32[1,128], index: 2, kind: input, shape index: {}]   ;;  %s3226_s3 = inlined_call_operand.vmem [shape: f32[128,128], index: 3, kind: input, shape index: {}]   ;;  %s3227_s4 = inlined_call_operand.vmem [shape: f32[1,128], index: 4, kind: input, shape index: {}]   ;;  %s3228_s5 = inlined_call_operand.vmem [shape: f32[1,64], index: 5, kind: input, shape index: {}]   ;;  %s3229_s6 = inlined_call_operand.<no memory space> [shape: f32[1,1], index: 6, kind: input, shape index: {}]   ;;  %s3230_s7 = inlined_call_operand.vmem [shape: f32[128,2], index: 7, kind: input, shape index: {}]   ;;  %s3231_s8 = inlined_call_operand.vmem [shape: f32[1,2], index: 8, kind: input, shape index: {}]   ;;  %s3232_s9 = inlined_call_operand.hbm [shape: f32[1,64], index: 9, kind: output, shape index: {0}]   ;;  %s3233_s10 = inlined_call_operand.hbm [shape: f32[1,128], index: 10, kind: output, shape index: {1}]   ;;  %s3234_s11 = inlined_call_operand.hbm [shape: f32[1,2], index: 11, kind: output, shape index: {2}]  }
   0x1   :  { %v17_v0 = vstv %s3229_s6 }
   0x2   :  { %18 = vst [vmem:[#allocation5] sm:$0x1] %v17_v0 }
   0x3   :  { %19 = vsyncpa [#allocation7], 0 }
   0x4   :  { %20 = vsyncpa [#allocation10], 0 }
   0x5   :  { %21 = vsyncpa [#allocation8], 0 }
   0x6   :  { %22 = vsyncpa [#allocation13], 0  ;;  %s2741_s19 = smov [#allocation6]  }
   0x7   :  { %s28_s20 = sshll.u32 %s2741_s19, 4  ;;  %s29_s20 = int_to_ptr.vmem [resolvable:$true] %s28_s20 }
   0x8   :  { %s2641_s21 = scalar_lea.vmem %s29_s20, 16384  ;;  %p2646_p1 = scmp.lt.s32.totalorder %s29_s20, %s29_s20 }
   0x9   :  { %p2642_p0 = scmp.ne.s32.totalorder %s29_s20, %s2641_s21  ;;  %p2647_p2 = scmp.lt.s32.totalorder %s2641_s21, %s2641_s21 }
   0xb   :  { %p2648_p3 = por %p2647_p2, %p2646_p1 }
   0xd   :  { %p2649_p4 = pnand %p2648_p3, %p2642_p0 }
   0xf   :  { %2652 = shalt.err (!%p2649_p4)
}
  0x10   :  { %s2742_s22 = smov 2048   ;;  %s2743_s23 = smov 128  }
  0x11   :  { %34 = dma.hbm_to_vmem [thread:$0]  %s3223_s0, 16384, %s29_s20, [#allocation7], %s2742_s22, %s2742_s22, %s2743_s23  }
  0x12   :  { %s2744_s6 = smov [#allocation9]  }
  0x13   :  { %s40_s26 = sshll.u32 %s2744_s6, 4  ;;  %s41_s26 = int_to_ptr.vmem [resolvable:$true] %s40_s26 }
  0x14   :  { %s2661_s27 = scalar_lea.vmem %s41_s26, 32768  ;;  %p2666_p6 = scmp.lt.s32.totalorder %s41_s26, %s41_s26 }
  0x15   :  { %p2662_p5 = scmp.ne.s32.totalorder %s41_s26, %s2661_s27  ;;  %p2667_p7 = scmp.lt.s32.totalorder %s2661_s27, %s2661_s27 }
  0x17   :  { %p2668_p8 = por %p2667_p7, %p2666_p6 }
  0x19   :  { %p2669_p9 = pnand %p2668_p8, %p2662_p5 }
  0x1b   :  { %2672 = shalt.err (!%p2669_p9)
}
  0x1c   :  { %s2745_s28 = smov 8  }
  0x1d   :  { %46 = dma.hbm_to_vmem [thread:$0]  %s3224_s1, 32768, %s41_s26, [#allocation10], %s2743_s23, %s2743_s23, %s2745_s28  }
  0x1e   :  { %2733 = dma.done.wait [#allocation7], 16384  }
  0x1f   :  { %2734 = vsyncadd [#allocation7], 4294950912 }
  0x20   :  { %2735 = dma.done.wait [#allocation10], 32768  }
  0x21   :  { %2736 = vsyncadd [#allocation10], 4294934528  ;;  %v234_v1 = vld [vmem:[#allocation9 + $0xf8] sm:$0xff]  ;;  %v233_v5 = vld [vmem:[#allocation9 + $0xf0] sm:$0xff]  ;;  %vm2748_vm0 = vmmov 0   ;;  %vm1549_vm1 = vcmask 523264  }
  0x22   :  { %v266_v2 = vld [vmem:[#allocation9 + $0x1f8] sm:$0xff]  ;;  %1940 = vmatprep.subr.mxu0 %v234_v1  ;;  %v265_v6 = vld [vmem:[#allocation9 + $0x1f0] sm:$0xff]  ;;  %v232_v9 = vld [vmem:[#allocation9 + $0xe8] sm:$0xff]  ;;  %vm71_vm2 = vcmask 0   ;;  %vm1654_vm4 = vcmask 516096   ;;  %s2751_s27 = smov [#allocation12]  }
  0x23   :  { %v218_v3 = vld [vmem:[#allocation9 + $0x78] sm:$0xff]  ;;  %1996 = vmatprep.subr.mxu1 %v266_v2  ;;  %v217_v7 = vld [vmem:[#allocation9 + $0x70] sm:$0xff]  ;;  %v264_v10 = vld [vmem:[#allocation9 + $0x1e8] sm:$0xff]  ;;  %s1893_s28 = sshll.u32 %s2751_s27, 4  ;;  %s1894_s28 = int_to_ptr.vmem [resolvable:$true] %s1893_s28 }
  0x24   :  { %v250_v4 = vld [vmem:[#allocation9 + $0x178] sm:$0xff]  ;;  %1941 = vmatpush3.msra.mxu0 %v218_v3  ;;  %v249_v8 = vld [vmem:[#allocation9 + $0x170] sm:$0xff]  ;;  %v216_v11 = vld [vmem:[#allocation9 + $0x68] sm:$0xff]  ;;  %s2673_s30 = scalar_lea.vmem %s1894_s28, 16  ;;  %s2677_s0 = scalar_lea.vmem %s1894_s28, 32 }
  0x25   :  { %1997 = vmatpush3.msra.mxu1 %v250_v4  ;;  %1942 = vmatprep.subr.mxu0 %v233_v5  ;;  %v248_v12 = vld [vmem:[#allocation9 + $0x168] sm:$0xff]  ;;  %v231_v13 = vld [vmem:[#allocation9 + $0xe0] sm:$0xff]  ;;  %v230_v17 = vld [vmem:[#allocation9 + $0xd8] sm:$0xff]  ;;  %p2674_p10 = scmp.ne.s32.totalorder %s1894_s28, %s2673_s30  ;;  %p2678_p11 = scmp.lt.s32.totalorder %s1894_s28, %s1894_s28 }
  0x26   :  { %1998 = vmatprep.subr.mxu1 %v265_v6  ;;  %1943 = vmatpush3.msra.mxu0 %v217_v7  ;;  %v263_v14 = vld [vmem:[#allocation9 + $0x1e0] sm:$0xff]  ;;  %v262_v18 = vld [vmem:[#allocation9 + $0x1d8] sm:$0xff]  ;;  %v229_v21 = vld [vmem:[#allocation9 + $0xd0] sm:$0xff]  ;;  %p2679_p12 = scmp.lt.s32.totalorder %s2677_s0, %s2673_s30 }
  0x27   :  { %1999 = vmatpush3.msra.mxu1 %v249_v8  ;;  %1944 = vmatprep.subr.mxu0 %v232_v9  ;;  %v215_v15 = vld [vmem:[#allocation9 + $0x60] sm:$0xff]  ;;  %v214_v19 = vld [vmem:[#allocation9 + $0x58] sm:$0xff]  ;;  %v261_v22 = vld [vmem:[#allocation9 + $0x1d0] sm:$0xff] }
  0x28   :  { %2000 = vmatprep.subr.mxu1 %v264_v10  ;;  %v247_v16 = vld [vmem:[#allocation9 + $0x160] sm:$0xff]  ;;  %1945 = vmatpush3.msra.mxu0 %v216_v11  ;;  %v246_v20 = vld [vmem:[#allocation9 + $0x158] sm:$0xff]  ;;  %v213_v23 = vld [vmem:[#allocation9 + $0x50] sm:$0xff]  ;;  %p2680_p13 = por %p2679_p12, %p2678_p11 }
  0x29   :  { %2001 = vmatpush3.msra.mxu1 %v248_v12  ;;  %1946 = vmatprep.subr.mxu0 %v231_v13  ;;  %v245_v24 = vld [vmem:[#allocation9 + $0x150] sm:$0xff]  ;;  %v228_v25 = vld [vmem:[#allocation9 + $0xc8] sm:$0xff]  ;;  %v227_v29 = vld [vmem:[#allocation9 + $0xc0] sm:$0xff] }
  0x2a   :  { %2002 = vmatprep.subr.mxu1 %v263_v14  ;;  %1947 = vmatpush3.msra.mxu0 %v215_v15  ;;  %v260_v26 = vld [vmem:[#allocation9 + $0x1c8] sm:$0xff]  ;;  %v259_v30 = vld [vmem:[#allocation9 + $0x1c0] sm:$0xff]  ;;  %v226_v33 = vld [vmem:[#allocation9 + $0xb8] sm:$0xff]  ;;  %p2681_p0 = pnand %p2680_p13, %p2674_p10 }
  0x2b   :  { %2003 = vmatpush3.msra.mxu1 %v247_v16  ;;  %1948 = vmatprep.subr.mxu0 %v230_v17  ;;  %v212_v27 = vld [vmem:[#allocation9 + $0x48] sm:$0xff]  ;;  %v211_v31 = vld [vmem:[#allocation9 + $0x40] sm:$0xff]  ;;  %v258_v34 = vld [vmem:[#allocation9 + $0x1b8] sm:$0xff] }
  0x2c   :  { %2004 = vmatprep.subr.mxu1 %v262_v18  ;;  %1949 = vmatpush3.msra.mxu0 %v214_v19  ;;  %v244_v28 = vld [vmem:[#allocation9 + $0x148] sm:$0xff]  ;;  %v243_v32 = vld [vmem:[#allocation9 + $0x140] sm:$0xff]  ;;  %v210_v35 = vld [vmem:[#allocation9 + $0x38] sm:$0xff] }
  0x2d   :  { %2005 = vmatpush3.msra.mxu1 %v246_v20  ;;  %1950 = vmatprep.subr.mxu0 %v229_v21  ;;  %v242_v36 = vld [vmem:[#allocation9 + $0x138] sm:$0xff]  ;;  %v225_v37 = vld [vmem:[#allocation9 + $0xb0] sm:$0xff]  ;;  %v224_v41 = vld [vmem:[#allocation9 + $0xa8] sm:$0xff] }
  0x2e   :  { %2006 = vmatprep.subr.mxu1 %v261_v22  ;;  %1951 = vmatpush3.msra.mxu0 %v213_v23  ;;  %v257_v38 = vld [vmem:[#allocation9 + $0x1b0] sm:$0xff]  ;;  %v256_v42 = vld [vmem:[#allocation9 + $0x1a8] sm:$0xff]  ;;  %v223_v45 = vld [vmem:[#allocation9 + $0xa0] sm:$0xff] }
  0x2f   :  { %2007 = vmatpush3.msra.mxu1 %v245_v24  ;;  %1952 = vmatprep.subr.mxu0 %v228_v25  ;;  %v209_v39 = vld [vmem:[#allocation9 + $0x30] sm:$0xff]  ;;  %v208_v43 = vld [vmem:[#allocation9 + $0x28] sm:$0xff]  ;;  %v255_v46 = vld [vmem:[#allocation9 + $0x1a0] sm:$0xff] }
  0x30   :  { %2008 = vmatprep.subr.mxu1 %v260_v26  ;;  %1953 = vmatpush3.msra.mxu0 %v212_v27  ;;  %v241_v40 = vld [vmem:[#allocation9 + $0x130] sm:$0xff]  ;;  %v240_v44 = vld [vmem:[#allocation9 + $0x128] sm:$0xff]  ;;  %v207_v47 = vld [vmem:[#allocation9 + $0x20] sm:$0xff] }
  0x31   :  { %2009 = vmatpush3.msra.mxu1 %v244_v28  ;;  %1954 = vmatprep.subr.mxu0 %v227_v29  ;;  %v239_v48 = vld [vmem:[#allocation9 + $0x120] sm:$0xff]  ;;  %v222_v49 = vld [vmem:[#allocation9 + $0x98] sm:$0xff]  ;;  %v221_v53 = vld [vmem:[#allocation9 + $0x90] sm:$0xff] }
  0x32   :  { %2010 = vmatprep.subr.mxu1 %v259_v30  ;;  %1955 = vmatpush3.msra.mxu0 %v211_v31  ;;  %v254_v50 = vld [vmem:[#allocation9 + $0x198] sm:$0xff]  ;;  %v253_v54 = vld [vmem:[#allocation9 + $0x190] sm:$0xff]  ;;  %v220_v57 = vld [vmem:[#allocation9 + $0x88] sm:$0xff] }
  0x33   :  { %2011 = vmatpush3.msra.mxu1 %v243_v32  ;;  %1956 = vmatprep.subr.mxu0 %v226_v33  ;;  %v206_v51 = vld [vmem:[#allocation9 + $0x18] sm:$0xff]  ;;  %v205_v55 = vld [vmem:[#allocation9 + $0x10] sm:$0xff]  ;;  %v252_v58 = vld [vmem:[#allocation9 + $0x188] sm:$0xff] }
  0x34   :  { %2012 = vmatprep.subr.mxu1 %v258_v34  ;;  %1957 = vmatpush3.msra.mxu0 %v210_v35  ;;  %v238_v52 = vld [vmem:[#allocation9 + $0x118] sm:$0xff]  ;;  %v237_v56 = vld [vmem:[#allocation9 + $0x110] sm:$0xff]  ;;  %v204_v59 = vld [vmem:[#allocation9 + $0x8] sm:$0xff] }
  0x35   :  { %2013 = vmatpush3.msra.mxu1 %v242_v36  ;;  %1958 = vmatprep.subr.mxu0 %v225_v37  ;;  %v236_v60 = vld [vmem:[#allocation9 + $0x108] sm:$0xff]  ;;  %v219_v61 = vld [vmem:[#allocation9 + $0x80] sm:$0xff]  ;;  %v78_v2 = vld [vmem:[#allocation6 + $0x18] sm:$0xff] }
  0x36   :  { %2014 = vmatprep.subr.mxu1 %v257_v38  ;;  %1959 = vmatpush3.msra.mxu0 %v209_v39  ;;  %v251_v62 = vld [vmem:[#allocation9 + $0x180] sm:$0xff]  ;;  %v76_v0 = vld [vmem:[#allocation6 + $0x8] sm:$0xff]  ;;  %v77_v4 = vld [vmem:[#allocation6 + $0x10] sm:$0xff] }
  0x37   :  { %2015 = vmatpush3.msra.mxu1 %v241_v40  ;;  %1960 = vmatprep.subr.mxu0 %v224_v41  ;;  %v203_v63 = vld [vmem:[#allocation9] sm:$0xff]  ;;  %v298_v5 = vld [vmem:[#allocation9 + $0x2f8] sm:$0xff]  ;;  %v297_v9 = vld [vmem:[#allocation9 + $0x2f0] sm:$0xff] }
  0x38   :  { %2016 = vmatprep.subr.mxu1 %v256_v42  ;;  %1961 = vmatpush3.msra.mxu0 %v208_v43  ;;  %v235_v1 = vld [vmem:[#allocation9 + $0x100] sm:$0xff]  ;;  %v330_v6 = vld [vmem:[#allocation9 + $0x3f8] sm:$0xff]  ;;  %v329_v10 = vld [vmem:[#allocation9 + $0x3f0] sm:$0xff] }
  0x39   :  { %2017 = vmatpush3.msra.mxu1 %v240_v44  ;;  %1962 = vmatprep.subr.mxu0 %v223_v45  ;;  %v75_v3 = vld [vmem:[#allocation6] sm:$0xff]  ;;  %v282_v7 = vld [vmem:[#allocation9 + $0x278] sm:$0xff]  ;;  %v92_v11 = vld [vmem:[#allocation6 + $0x88] sm:$0xff] }
  0x3a   :  { %2018 = vmatprep.subr.mxu1 %v255_v46  ;;  %1963 = vmatpush3.msra.mxu0 %v207_v47  ;;  %v314_v8 = vld [vmem:[#allocation9 + $0x378] sm:$0xff]  ;;  %v281_v13 = vld [vmem:[#allocation9 + $0x270] sm:$0xff]  ;;  %v91_v15 = vld [vmem:[#allocation6 + $0x80] sm:$0xff] }
  0x3b   :  { %2019 = vmatpush3.msra.mxu1 %v239_v48  ;;  %1964 = vmatprep.subr.mxu0 %v222_v49  ;;  %v94_v12 = vld [vmem:[#allocation6 + $0x98] sm:$0xff]  ;;  %v313_v14 = vld [vmem:[#allocation9 + $0x370] sm:$0xff]  ;;  %v296_v17 = vld [vmem:[#allocation9 + $0x2e8] sm:$0xff] }
  0x3c   :  { %2020 = vmatprep.subr.mxu1 %v254_v50  ;;  %1965 = vmatpush3.msra.mxu0 %v206_v51  ;;  %v93_v16 = vld [vmem:[#allocation6 + $0x90] sm:$0xff]  ;;  %v328_v18 = vld [vmem:[#allocation9 + $0x3e8] sm:$0xff]  ;;  %v295_v21 = vld [vmem:[#allocation9 + $0x2e0] sm:$0xff] }
  0x3d   :  { %2021 = vmatpush3.msra.mxu1 %v238_v52  ;;  %1966 = vmatprep.subr.mxu0 %v221_v53  ;;  %v280_v19 = vld [vmem:[#allocation9 + $0x268] sm:$0xff]  ;;  %v327_v22 = vld [vmem:[#allocation9 + $0x3e0] sm:$0xff]  ;;  %v110_v24 = vld [vmem:[#allocation6 + $0x118] sm:$0xff] }
  0x3e   :  { %2022 = vmatprep.subr.mxu1 %v253_v54  ;;  %1967 = vmatpush3.msra.mxu0 %v205_v55  ;;  %v312_v20 = vld [vmem:[#allocation9 + $0x368] sm:$0xff]  ;;  %v279_v25 = vld [vmem:[#allocation9 + $0x260] sm:$0xff]  ;;  %v109_v28 = vld [vmem:[#allocation6 + $0x110] sm:$0xff] }
  0x3f   :  { %2023 = vmatpush3.msra.mxu1 %v237_v56  ;;  %1968 = vmatprep.subr.mxu0 %v220_v57  ;;  %v108_v23 = vld [vmem:[#allocation6 + $0x108] sm:$0xff]  ;;  %v311_v26 = vld [vmem:[#allocation9 + $0x360] sm:$0xff]  ;;  %v294_v29 = vld [vmem:[#allocation9 + $0x2d8] sm:$0xff] }
  0x40   :  { %2024 = vmatprep.subr.mxu1 %v252_v58  ;;  %1969 = vmatpush3.msra.mxu0 %v204_v59  ;;  %v107_v27 = vld [vmem:[#allocation6 + $0x100] sm:$0xff]  ;;  %v326_v30 = vld [vmem:[#allocation9 + $0x3d8] sm:$0xff]  ;;  %v293_v33 = vld [vmem:[#allocation9 + $0x2d0] sm:$0xff] }
  0x41   :  { %2025 = vmatpush3.msra.mxu1 %v236_v60  ;;  %1970 = vmatprep.subr.mxu0 %v219_v61  ;;  %v278_v31 = vld [vmem:[#allocation9 + $0x258] sm:$0xff]  ;;  %v325_v34 = vld [vmem:[#allocation9 + $0x3d0] sm:$0xff]  ;;  %v124_v35 = vld [vmem:[#allocation6 + $0x188] sm:$0xff] }
  0x42   :  { %2026 = vmatprep.subr.mxu1 %v251_v62  ;;  %1971 = vmatpush3.msra.mxu0 %v203_v63  ;;  %v310_v32 = vld [vmem:[#allocation9 + $0x358] sm:$0xff]  ;;  %v277_v37 = vld [vmem:[#allocation9 + $0x250] sm:$0xff]  ;;  %v123_v39 = vld [vmem:[#allocation6 + $0x180] sm:$0xff] }
  0x43   :  { %530 = vmatprep.mubr.f32.mxu0 %v76_v0  ;;  %2027 = vmatpush3.msra.mxu1 %v235_v1  ;;  %v126_v36 = vld [vmem:[#allocation6 + $0x198] sm:$0xff]  ;;  %v309_v38 = vld [vmem:[#allocation9 + $0x350] sm:$0xff]  ;;  %v292_v41 = vld [vmem:[#allocation9 + $0x2c8] sm:$0xff] }
  0x44   :  { %635 = vmatprep.mubr.f32.mxu1 %v78_v2  ;;  %531 = vmatmul.mubr.f32.vlgmr.msra.gmra.mxu0 %v75_v3  ;;  %v125_v40 = vld [vmem:[#allocation6 + $0x190] sm:$0xff]  ;;  %v324_v42 = vld [vmem:[#allocation9 + $0x3c8] sm:$0xff]  ;;  %v291_v45 = vld [vmem:[#allocation9 + $0x2c0] sm:$0xff] }
  0x45   :  { %636 = vmatmul.mubr.f32.vlgmr.msra.gmra.mxu1 %v77_v4  ;;  %2052 = vmatprep.subr.mxu0 %v298_v5  ;;  %v276_v43 = vld [vmem:[#allocation9 + $0x248] sm:$0xff]  ;;  %v323_v46 = vld [vmem:[#allocation9 + $0x3c0] sm:$0xff]  ;;  %v142_v48 = vld [vmem:[#allocation6 + $0x218] sm:$0xff] }
  0x46   :  { %2108 = vmatprep.subr.mxu1 %v330_v6  ;;  %2053 = vmatpush3.msra.mxu0 %v282_v7  ;;  %v308_v44 = vld [vmem:[#allocation9 + $0x348] sm:$0xff]  ;;  %v275_v49 = vld [vmem:[#allocation9 + $0x240] sm:$0xff]  ;;  %v141_v52 = vld [vmem:[#allocation6 + $0x210] sm:$0xff] }
  0x47   :  { %2109 = vmatpush3.msra.mxu1 %v314_v8  ;;  %2054 = vmatprep.subr.mxu0 %v297_v9  ;;  %v140_v47 = vld [vmem:[#allocation6 + $0x208] sm:$0xff]  ;;  %v307_v50 = vld [vmem:[#allocation9 + $0x340] sm:$0xff]  ;;  %v290_v53 = vld [vmem:[#allocation9 + $0x2b8] sm:$0xff] }
  0x48   :  { %2110 = vmatprep.subr.mxu1 %v329_v10  ;;  %535 = vmatprep.mubr.f32.mxu0 %v92_v11  ;;  %v139_v51 = vld [vmem:[#allocation6 + $0x200] sm:$0xff]  ;;  %v322_v54 = vld [vmem:[#allocation9 + $0x3b8] sm:$0xff]  ;;  %v289_v57 = vld [vmem:[#allocation9 + $0x2b0] sm:$0xff] }
  0x49   :  { %640 = vmatprep.mubr.f32.mxu1 %v94_v12  ;;  %2055 = vmatpush3.msra.mxu0 %v281_v13  ;;  %v274_v55 = vld [vmem:[#allocation9 + $0x238] sm:$0xff]  ;;  %v321_v58 = vld [vmem:[#allocation9 + $0x3b0] sm:$0xff]  ;;  %v156_v59 = vld [vmem:[#allocation6 + $0x288] sm:$0xff] }
  0x4a   :  { %2111 = vmatpush3.msra.mxu1 %v313_v14  ;;  %536 = vmatmul.mubr.f32.gmra.mxu0 %v91_v15  ;;  %v306_v56 = vld [vmem:[#allocation9 + $0x338] sm:$0xff]  ;;  %v273_v61 = vld [vmem:[#allocation9 + $0x230] sm:$0xff]  ;;  %v155_v63 = vld [vmem:[#allocation6 + $0x280] sm:$0xff] }
  0x4b   :  { %641 = vmatmul.mubr.f32.gmra.mxu1 %v93_v16  ;;  %2056 = vmatprep.subr.mxu0 %v296_v17  ;;  %v158_v60 = vld [vmem:[#allocation6 + $0x298] sm:$0xff]  ;;  %v305_v62 = vld [vmem:[#allocation9 + $0x330] sm:$0xff]  ;;  %v288_v1 = vld [vmem:[#allocation9 + $0x2a8] sm:$0xff] }
  0x4c   :  { %2112 = vmatprep.subr.mxu1 %v328_v18  ;;  %2057 = vmatpush3.msra.mxu0 %v280_v19  ;;  %v157_v0 = vld [vmem:[#allocation6 + $0x290] sm:$0xff]  ;;  %v320_v2 = vld [vmem:[#allocation9 + $0x3a8] sm:$0xff]  ;;  %v287_v5 = vld [vmem:[#allocation9 + $0x2a0] sm:$0xff] }
  0x4d   :  { %2113 = vmatpush3.msra.mxu1 %v312_v20  ;;  %2058 = vmatprep.subr.mxu0 %v295_v21  ;;  %v272_v3 = vld [vmem:[#allocation9 + $0x228] sm:$0xff]  ;;  %v319_v6 = vld [vmem:[#allocation9 + $0x3a0] sm:$0xff]  ;;  %v174_v8 = vld [vmem:[#allocation6 + $0x318] sm:$0xff] }
  0x4e   :  { %2114 = vmatprep.subr.mxu1 %v327_v22  ;;  %540 = vmatprep.mubr.f32.mxu0 %v108_v23  ;;  %v304_v4 = vld [vmem:[#allocation9 + $0x328] sm:$0xff]  ;;  %v271_v9 = vld [vmem:[#allocation9 + $0x220] sm:$0xff]  ;;  %v173_v12 = vld [vmem:[#allocation6 + $0x310] sm:$0xff] }
  0x4f   :  { %645 = vmatprep.mubr.f32.mxu1 %v110_v24  ;;  %2059 = vmatpush3.msra.mxu0 %v279_v25  ;;  %v172_v7 = vld [vmem:[#allocation6 + $0x308] sm:$0xff]  ;;  %v303_v10 = vld [vmem:[#allocation9 + $0x320] sm:$0xff]  ;;  %v286_v13 = vld [vmem:[#allocation9 + $0x298] sm:$0xff] }
  0x50   :  { %2115 = vmatpush3.msra.mxu1 %v311_v26  ;;  %541 = vmatmul.mubr.f32.gmra.mxu0 %v107_v27  ;;  %v171_v11 = vld [vmem:[#allocation6 + $0x300] sm:$0xff]  ;;  %v318_v14 = vld [vmem:[#allocation9 + $0x398] sm:$0xff]  ;;  %v285_v17 = vld [vmem:[#allocation9 + $0x290] sm:$0xff] }
  0x51   :  { %646 = vmatmul.mubr.f32.gmra.mxu1 %v109_v28  ;;  %2060 = vmatprep.subr.mxu0 %v294_v29  ;;  %v270_v15 = vld [vmem:[#allocation9 + $0x218] sm:$0xff]  ;;  %v317_v18 = vld [vmem:[#allocation9 + $0x390] sm:$0xff]  ;;  %v188_v19 = vld [vmem:[#allocation6 + $0x388] sm:$0xff] }
  0x52   :  { %2116 = vmatprep.subr.mxu1 %v326_v30  ;;  %2061 = vmatpush3.msra.mxu0 %v278_v31  ;;  %v302_v16 = vld [vmem:[#allocation9 + $0x318] sm:$0xff]  ;;  %v269_v21 = vld [vmem:[#allocation9 + $0x210] sm:$0xff]  ;;  %v187_v23 = vld [vmem:[#allocation6 + $0x380] sm:$0xff] }
  0x53   :  { %2117 = vmatpush3.msra.mxu1 %v310_v32  ;;  %2062 = vmatprep.subr.mxu0 %v293_v33  ;;  %v190_v20 = vld [vmem:[#allocation6 + $0x398] sm:$0xff]  ;;  %v301_v22 = vld [vmem:[#allocation9 + $0x310] sm:$0xff]  ;;  %v284_v25 = vld [vmem:[#allocation9 + $0x288] sm:$0xff] }
  0x54   :  { %2118 = vmatprep.subr.mxu1 %v325_v34  ;;  %545 = vmatprep.mubr.f32.mxu0 %v124_v35  ;;  %v189_v24 = vld [vmem:[#allocation6 + $0x390] sm:$0xff]  ;;  %v316_v26 = vld [vmem:[#allocation9 + $0x388] sm:$0xff]  ;;  %v283_v29 = vld [vmem:[#allocation9 + $0x280] sm:$0xff] }
  0x55   :  { %650 = vmatprep.mubr.f32.mxu1 %v126_v36  ;;  %2063 = vmatpush3.msra.mxu0 %v277_v37  ;;  %v268_v27 = vld [vmem:[#allocation9 + $0x208] sm:$0xff]  ;;  %v315_v30 = vld [vmem:[#allocation9 + $0x380] sm:$0xff]  ;;  %v82_v34 = vld [vmem:[#allocation6 + $0x38] sm:$0xff] }
  0x56   :  { %2119 = vmatpush3.msra.mxu1 %v309_v38  ;;  %546 = vmatmul.mubr.f32.gmra.mxu0 %v123_v39  ;;  %v300_v28 = vld [vmem:[#allocation9 + $0x308] sm:$0xff]  ;;  %v267_v31 = vld [vmem:[#allocation9 + $0x200] sm:$0xff]  ;;  %v81_v36 = vld [vmem:[#allocation6 + $0x30] sm:$0xff] }
  0x57   :  { %651 = vmatmul.mubr.f32.gmra.mxu1 %v125_v40  ;;  %2064 = vmatprep.subr.mxu0 %v292_v41  ;;  %v80_v32 = vld [vmem:[#allocation6 + $0x28] sm:$0xff]  ;;  %v299_v33 = vld [vmem:[#allocation9 + $0x300] sm:$0xff]  ;;  %v362_v37 = vld [vmem:[#allocation9 + $0x4f8] sm:$0xff] }
  0x58   :  { %2120 = vmatprep.subr.mxu1 %v324_v42  ;;  %2065 = vmatpush3.msra.mxu0 %v276_v43  ;;  %v79_v35 = vld [vmem:[#allocation6 + $0x20] sm:$0xff]  ;;  %v394_v38 = vld [vmem:[#allocation9 + $0x5f8] sm:$0xff]  ;;  %v361_v41 = vld [vmem:[#allocation9 + $0x4f0] sm:$0xff] }
  0x59   :  { %2121 = vmatpush3.msra.mxu1 %v308_v44  ;;  %2066 = vmatprep.subr.mxu0 %v291_v45  ;;  %v346_v39 = vld [vmem:[#allocation9 + $0x478] sm:$0xff]  ;;  %v393_v42 = vld [vmem:[#allocation9 + $0x5f0] sm:$0xff]  ;;  %v96_v43 = vld [vmem:[#allocation6 + $0xa8] sm:$0xff] }
  0x5a   :  { %2122 = vmatprep.subr.mxu1 %v323_v46  ;;  %550 = vmatprep.mubr.f32.mxu0 %v140_v47  ;;  %v378_v40 = vld [vmem:[#allocation9 + $0x578] sm:$0xff]  ;;  %v345_v45 = vld [vmem:[#allocation9 + $0x470] sm:$0xff]  ;;  %v95_v47 = vld [vmem:[#allocation6 + $0xa0] sm:$0xff] }
  0x5b   :  { %655 = vmatprep.mubr.f32.mxu1 %v142_v48  ;;  %2067 = vmatpush3.msra.mxu0 %v275_v49  ;;  %v98_v44 = vld [vmem:[#allocation6 + $0xb8] sm:$0xff]  ;;  %v377_v46 = vld [vmem:[#allocation9 + $0x570] sm:$0xff]  ;;  %v360_v49 = vld [vmem:[#allocation9 + $0x4e8] sm:$0xff] }
  0x5c   :  { %2123 = vmatpush3.msra.mxu1 %v307_v50  ;;  %551 = vmatmul.mubr.f32.gmra.mxu0 %v139_v51  ;;  %v97_v48 = vld [vmem:[#allocation6 + $0xb0] sm:$0xff]  ;;  %v392_v50 = vld [vmem:[#allocation9 + $0x5e8] sm:$0xff] }
  0x5d   :  { %656 = vmatmul.mubr.f32.gmra.mxu1 %v141_v52  ;;  %2068 = vmatprep.subr.mxu0 %v290_v53  ;;  %v344_v51 = vld [vmem:[#allocation9 + $0x468] sm:$0xff]  ;;  %v359_v53 = vld [vmem:[#allocation9 + $0x4e0] sm:$0xff] }
  0x5e   :  { %2124 = vmatprep.subr.mxu1 %v322_v54  ;;  %2069 = vmatpush3.msra.mxu0 %v274_v55  ;;  %v376_v52 = vld [vmem:[#allocation9 + $0x568] sm:$0xff]  ;;  %v391_v54 = vld [vmem:[#allocation9 + $0x5e0] sm:$0xff] }
  0x5f   :  { %2125 = vmatpush3.msra.mxu1 %v306_v56  ;;  %2070 = vmatprep.subr.mxu0 %v289_v57  ;;  %v112_v55 = vld [vmem:[#allocation6 + $0x128] sm:$0xff]  ;;  %v114_v56 = vld [vmem:[#allocation6 + $0x138] sm:$0xff]  ;;  %v343_v57 = vld [vmem:[#allocation9 + $0x460] sm:$0xff] }
  0x60   :  { %2126 = vmatprep.subr.mxu1 %v321_v58  ;;  %555 = vmatprep.mubr.f32.mxu0 %v156_v59  ;;  %v375_v58 = vld [vmem:[#allocation9 + $0x560] sm:$0xff] }
  0x61   :  { %660 = vmatprep.mubr.f32.mxu1 %v158_v60  ;;  %2071 = vmatpush3.msra.mxu0 %v273_v61  ;;  %v111_v59 = vld [vmem:[#allocation6 + $0x120] sm:$0xff]  ;;  %v113_v60 = vld [vmem:[#allocation6 + $0x130] sm:$0xff]  ;;  %v358_v61 = vld [vmem:[#allocation9 + $0x4d8] sm:$0xff] }
  0x62   :  { %2127 = vmatpush3.msra.mxu1 %v305_v62  ;;  %556 = vmatmul.mubr.f32.gmra.mxu0 %v155_v63  ;;  %v390_v62 = vld [vmem:[#allocation9 + $0x5d8] sm:$0xff] }
  0x63   :  { %661 = vmatmul.mubr.f32.gmra.mxu1 %v157_v0  ;;  %2072 = vmatprep.subr.mxu0 %v288_v1  ;;  %v342_v63 = vld [vmem:[#allocation9 + $0x458] sm:$0xff]  ;;  %v357_v1 = vld [vmem:[#allocation9 + $0x4d0] sm:$0xff] }
  0x64   :  { %2128 = vmatprep.subr.mxu1 %v320_v2  ;;  %2073 = vmatpush3.msra.mxu0 %v272_v3  ;;  %v374_v0 = vld [vmem:[#allocation9 + $0x558] sm:$0xff]  ;;  %v389_v2 = vld [vmem:[#allocation9 + $0x5d0] sm:$0xff]  ;;  %v128_v3 = vld [vmem:[#allocation6 + $0x1a8] sm:$0xff] }
  0x65   :  { %2129 = vmatpush3.msra.mxu1 %v304_v4  ;;  %2074 = vmatprep.subr.mxu0 %v287_v5  ;;  %v130_v4 = vld [vmem:[#allocation6 + $0x1b8] sm:$0xff]  ;;  %v341_v5 = vld [vmem:[#allocation9 + $0x450] sm:$0xff] }
  0x66   :  { %2130 = vmatprep.subr.mxu1 %v319_v6  ;;  %560 = vmatprep.mubr.f32.mxu0 %v172_v7  ;;  %v373_v6 = vld [vmem:[#allocation9 + $0x550] sm:$0xff]  ;;  %v127_v7 = vld [vmem:[#allocation6 + $0x1a0] sm:$0xff] }
  0x67   :  { %665 = vmatprep.mubr.f32.mxu1 %v174_v8  ;;  %2075 = vmatpush3.msra.mxu0 %v271_v9  ;;  %v129_v8 = vld [vmem:[#allocation6 + $0x1b0] sm:$0xff]  ;;  %v356_v9 = vld [vmem:[#allocation9 + $0x4c8] sm:$0xff] }
  0x68   :  { %2131 = vmatpush3.msra.mxu1 %v303_v10  ;;  %561 = vmatmul.mubr.f32.gmra.mxu0 %v171_v11  ;;  %v388_v10 = vld [vmem:[#allocation9 + $0x5c8] sm:$0xff] }
  0x69   :  { %666 = vmatmul.mubr.f32.gmra.mxu1 %v173_v12  ;;  %2076 = vmatprep.subr.mxu0 %v286_v13  ;;  %v340_v11 = vld [vmem:[#allocation9 + $0x448] sm:$0xff]  ;;  %v355_v13 = vld [vmem:[#allocation9 + $0x4c0] sm:$0xff] }
  0x6a   :  { %2132 = vmatprep.subr.mxu1 %v318_v14  ;;  %2077 = vmatpush3.msra.mxu0 %v270_v15  ;;  %v372_v12 = vld [vmem:[#allocation9 + $0x548] sm:$0xff]  ;;  %v387_v14 = vld [vmem:[#allocation9 + $0x5c0] sm:$0xff] }
  0x6b   :  { %2133 = vmatpush3.msra.mxu1 %v302_v16  ;;  %2078 = vmatprep.subr.mxu0 %v285_v17  ;;  %v144_v15 = vld [vmem:[#allocation6 + $0x228] sm:$0xff]  ;;  %v146_v16 = vld [vmem:[#allocation6 + $0x238] sm:$0xff]  ;;  %v339_v17 = vld [vmem:[#allocation9 + $0x440] sm:$0xff] }
  0x6c   :  { %2134 = vmatprep.subr.mxu1 %v317_v18  ;;  %565 = vmatprep.mubr.f32.mxu0 %v188_v19  ;;  %v371_v18 = vld [vmem:[#allocation9 + $0x540] sm:$0xff] }
  0x6d   :  { %670 = vmatprep.mubr.f32.mxu1 %v190_v20  ;;  %2079 = vmatpush3.msra.mxu0 %v269_v21  ;;  %v143_v19 = vld [vmem:[#allocation6 + $0x220] sm:$0xff]  ;;  %v145_v20 = vld [vmem:[#allocation6 + $0x230] sm:$0xff]  ;;  %v354_v21 = vld [vmem:[#allocation9 + $0x4b8] sm:$0xff] }
  0x6e   :  { %2135 = vmatpush3.msra.mxu1 %v301_v22  ;;  %566 = vmatmul.mubr.f32.gmra.mxu0 %v187_v23  ;;  %v386_v22 = vld [vmem:[#allocation9 + $0x5b8] sm:$0xff] }
  0x6f   :  { %671 = vmatmul.mubr.f32.gmra.mxu1 %v189_v24  ;;  %2080 = vmatprep.subr.mxu0 %v284_v25  ;;  %v338_v23 = vld [vmem:[#allocation9 + $0x438] sm:$0xff]  ;;  %v353_v25 = vld [vmem:[#allocation9 + $0x4b0] sm:$0xff] }
  0x70   :  { %2136 = vmatprep.subr.mxu1 %v316_v26  ;;  %2081 = vmatpush3.msra.mxu0 %v268_v27  ;;  %v370_v24 = vld [vmem:[#allocation9 + $0x538] sm:$0xff]  ;;  %v385_v26 = vld [vmem:[#allocation9 + $0x5b0] sm:$0xff]  ;;  %v160_v27 = vld [vmem:[#allocation6 + $0x2a8] sm:$0xff] }
  0x71   :  { %2137 = vmatpush3.msra.mxu1 %v300_v28  ;;  %2082 = vmatprep.subr.mxu0 %v283_v29  ;;  %v162_v28 = vld [vmem:[#allocation6 + $0x2b8] sm:$0xff]  ;;  %v337_v29 = vld [vmem:[#allocation9 + $0x430] sm:$0xff] }
  0x72   :  { %2138 = vmatprep.subr.mxu1 %v315_v30  ;;  %2083 = vmatpush3.msra.mxu0 %v267_v31  ;;  %v369_v30 = vld [vmem:[#allocation9 + $0x530] sm:$0xff]  ;;  %v159_v31 = vld [vmem:[#allocation6 + $0x2a0] sm:$0xff] }
  0x73   :  { %740 = vmatprep.mubr.f32.mxu0 %v80_v32  ;;  %2139 = vmatpush3.msra.mxu1 %v299_v33  ;;  %v161_v32 = vld [vmem:[#allocation6 + $0x2b0] sm:$0xff]  ;;  %v352_v33 = vld [vmem:[#allocation9 + $0x4a8] sm:$0xff] }
  0x74   :  { %845 = vmatprep.mubr.f32.mxu1 %v82_v34  ;;  %741 = vmatmul.mubr.f32.vlgmr.msra.gmra.mxu0 %v79_v35  ;;  %v384_v34 = vld [vmem:[#allocation9 + $0x5a8] sm:$0xff] }
  0x75   :  { %846 = vmatmul.mubr.f32.vlgmr.msra.gmra.mxu1 %v81_v36  ;;  %2164 = vmatprep.subr.mxu0 %v362_v37  ;;  %v336_v35 = vld [vmem:[#allocation9 + $0x428] sm:$0xff]  ;;  %v351_v37 = vld [vmem:[#allocation9 + $0x4a0] sm:$0xff] }
  0x76   :  { %2220 = vmatprep.subr.mxu1 %v394_v38  ;;  %2165 = vmatpush3.msra.mxu0 %v346_v39  ;;  %v368_v36 = vld [vmem:[#allocation9 + $0x528] sm:$0xff]  ;;  %v383_v38 = vld [vmem:[#allocation9 + $0x5a0] sm:$0xff] }
  0x77   :  { %2221 = vmatpush3.msra.mxu1 %v378_v40  ;;  %2166 = vmatprep.subr.mxu0 %v361_v41  ;;  %v176_v39 = vld [vmem:[#allocation6 + $0x328] sm:$0xff]  ;;  %v178_v40 = vld [vmem:[#allocation6 + $0x338] sm:$0xff]  ;;  %v335_v41 = vld [vmem:[#allocation9 + $0x420] sm:$0xff] }
  0x78   :  { %2222 = vmatprep.subr.mxu1 %v393_v42  ;;  %745 = vmatprep.mubr.f32.mxu0 %v96_v43  ;;  %v367_v42 = vld [vmem:[#allocation9 + $0x520] sm:$0xff] }
  0x79   :  { %850 = vmatprep.mubr.f32.mxu1 %v98_v44  ;;  %2167 = vmatpush3.msra.mxu0 %v345_v45  ;;  %v175_v43 = vld [vmem:[#allocation6 + $0x320] sm:$0xff]  ;;  %v177_v44 = vld [vmem:[#allocation6 + $0x330] sm:$0xff]  ;;  %v350_v45 = vld [vmem:[#allocation9 + $0x498] sm:$0xff] }
  0x7a   :  { %2223 = vmatpush3.msra.mxu1 %v377_v46  ;;  %746 = vmatmul.mubr.f32.gmra.mxu0 %v95_v47  ;;  %v382_v46 = vld [vmem:[#allocation9 + $0x598] sm:$0xff] }
  0x7b   :  { %851 = vmatmul.mubr.f32.gmra.mxu1 %v97_v48  ;;  %2168 = vmatprep.subr.mxu0 %v360_v49  ;;  %v334_v47 = vld [vmem:[#allocation9 + $0x418] sm:$0xff]  ;;  %v349_v49 = vld [vmem:[#allocation9 + $0x490] sm:$0xff] }
  0x7c   :  { %2224 = vmatprep.subr.mxu1 %v392_v50  ;;  %2169 = vmatpush3.msra.mxu0 %v344_v51  ;;  %v366_v48 = vld [vmem:[#allocation9 + $0x518] sm:$0xff]  ;;  %v381_v50 = vld [vmem:[#allocation9 + $0x590] sm:$0xff]  ;;  %v192_v51 = vld [vmem:[#allocation6 + $0x3a8] sm:$0xff] }
  0x7d   :  { %2225 = vmatpush3.msra.mxu1 %v376_v52  ;;  %2170 = vmatprep.subr.mxu0 %v359_v53  ;;  %v194_v52 = vld [vmem:[#allocation6 + $0x3b8] sm:$0xff]  ;;  %v333_v53 = vld [vmem:[#allocation9 + $0x410] sm:$0xff] }
  0x7e   :  { %2226 = vmatprep.subr.mxu1 %v391_v54  ;;  %750 = vmatprep.mubr.f32.mxu0 %v112_v55  ;;  %v365_v54 = vld [vmem:[#allocation9 + $0x510] sm:$0xff]  ;;  %v191_v55 = vld [vmem:[#allocation6 + $0x3a0] sm:$0xff] }
  0x7f   :  { %855 = vmatprep.mubr.f32.mxu1 %v114_v56  ;;  %2171 = vmatpush3.msra.mxu0 %v343_v57  ;;  %v193_v56 = vld [vmem:[#allocation6 + $0x3b0] sm:$0xff]  ;;  %v348_v57 = vld [vmem:[#allocation9 + $0x488] sm:$0xff] }
  0x80   :  { %2227 = vmatpush3.msra.mxu1 %v375_v58  ;;  %751 = vmatmul.mubr.f32.gmra.mxu0 %v111_v59  ;;  %v380_v58 = vld [vmem:[#allocation9 + $0x588] sm:$0xff] }
  0x81   :  { %856 = vmatmul.mubr.f32.gmra.mxu1 %v113_v60  ;;  %2172 = vmatprep.subr.mxu0 %v358_v61  ;;  %v332_v59 = vld [vmem:[#allocation9 + $0x408] sm:$0xff]  ;;  %v347_v61 = vld [vmem:[#allocation9 + $0x480] sm:$0xff] }
  0x82   :  { %2228 = vmatprep.subr.mxu1 %v390_v62  ;;  %2173 = vmatpush3.msra.mxu0 %v342_v63  ;;  %v364_v60 = vld [vmem:[#allocation9 + $0x508] sm:$0xff]  ;;  %v379_v62 = vld [vmem:[#allocation9 + $0x580] sm:$0xff] }
  0x83   :  { %2229 = vmatpush3.msra.mxu1 %v374_v0  ;;  %2174 = vmatprep.subr.mxu0 %v357_v1  ;;  %v331_v63 = vld [vmem:[#allocation9 + $0x400] sm:$0xff]  ;;  %v84_v0 = vld [vmem:[#allocation6 + $0x48] sm:$0xff] }
  0x84   :  { %2230 = vmatprep.subr.mxu1 %v389_v2  ;;  %755 = vmatprep.mubr.f32.mxu0 %v128_v3  ;;  %v363_v1 = vld [vmem:[#allocation9 + $0x500] sm:$0xff]  ;;  %v86_v2 = vld [vmem:[#allocation6 + $0x58] sm:$0xff] }
  0x85   :  { %860 = vmatprep.mubr.f32.mxu1 %v130_v4  ;;  %2175 = vmatpush3.msra.mxu0 %v341_v5  ;;  %v83_v3 = vld [vmem:[#allocation6 + $0x40] sm:$0xff]  ;;  %v85_v4 = vld [vmem:[#allocation6 + $0x50] sm:$0xff]  ;;  %v426_v5 = vld [vmem:[#allocation9 + $0x6f8] sm:$0xff] }
  0x86   :  { %2231 = vmatpush3.msra.mxu1 %v373_v6  ;;  %756 = vmatmul.mubr.f32.gmra.mxu0 %v127_v7  ;;  %v458_v6 = vld [vmem:[#allocation9 + $0x7f8] sm:$0xff] }
  0x87   :  { %861 = vmatmul.mubr.f32.gmra.mxu1 %v129_v8  ;;  %2176 = vmatprep.subr.mxu0 %v356_v9  ;;  %v410_v7 = vld [vmem:[#allocation9 + $0x678] sm:$0xff]  ;;  %v425_v9 = vld [vmem:[#allocation9 + $0x6f0] sm:$0xff] }
  0x88   :  { %2232 = vmatprep.subr.mxu1 %v388_v10  ;;  %2177 = vmatpush3.msra.mxu0 %v340_v11  ;;  %v442_v8 = vld [vmem:[#allocation9 + $0x778] sm:$0xff]  ;;  %v457_v10 = vld [vmem:[#allocation9 + $0x7f0] sm:$0xff]  ;;  %v100_v11 = vld [vmem:[#allocation6 + $0xc8] sm:$0xff] }
  0x89   :  { %2233 = vmatpush3.msra.mxu1 %v372_v12  ;;  %2178 = vmatprep.subr.mxu0 %v355_v13  ;;  %v102_v12 = vld [vmem:[#allocation6 + $0xd8] sm:$0xff]  ;;  %v409_v13 = vld [vmem:[#allocation9 + $0x670] sm:$0xff] }
  0x8a   :  { %2234 = vmatprep.subr.mxu1 %v387_v14  ;;  %760 = vmatprep.mubr.f32.mxu0 %v144_v15  ;;  %v441_v14 = vld [vmem:[#allocation9 + $0x770] sm:$0xff]  ;;  %v99_v15 = vld [vmem:[#allocation6 + $0xc0] sm:$0xff] }
  0x8b   :  { %865 = vmatprep.mubr.f32.mxu1 %v146_v16  ;;  %2179 = vmatpush3.msra.mxu0 %v339_v17  ;;  %v101_v16 = vld [vmem:[#allocation6 + $0xd0] sm:$0xff]  ;;  %v424_v17 = vld [vmem:[#allocation9 + $0x6e8] sm:$0xff] }
  0x8c   :  { %2235 = vmatpush3.msra.mxu1 %v371_v18  ;;  %761 = vmatmul.mubr.f32.gmra.mxu0 %v143_v19  ;;  %v456_v18 = vld [vmem:[#allocation9 + $0x7e8] sm:$0xff] }
  0x8d   :  { %866 = vmatmul.mubr.f32.gmra.mxu1 %v145_v20  ;;  %2180 = vmatprep.subr.mxu0 %v354_v21  ;;  %v408_v19 = vld [vmem:[#allocation9 + $0x668] sm:$0xff]  ;;  %v423_v21 = vld [vmem:[#allocation9 + $0x6e0] sm:$0xff] }
  0x8e   :  { %2236 = vmatprep.subr.mxu1 %v386_v22  ;;  %2181 = vmatpush3.msra.mxu0 %v338_v23  ;;  %v440_v20 = vld [vmem:[#allocation9 + $0x768] sm:$0xff]  ;;  %v455_v22 = vld [vmem:[#allocation9 + $0x7e0] sm:$0xff] }
  0x8f   :  { %2237 = vmatpush3.msra.mxu1 %v370_v24  ;;  %2182 = vmatprep.subr.mxu0 %v353_v25  ;;  %v116_v23 = vld [vmem:[#allocation6 + $0x148] sm:$0xff]  ;;  %v118_v24 = vld [vmem:[#allocation6 + $0x158] sm:$0xff]  ;;  %v407_v25 = vld [vmem:[#allocation9 + $0x660] sm:$0xff] }
  0x90   :  { %2238 = vmatprep.subr.mxu1 %v385_v26  ;;  %765 = vmatprep.mubr.f32.mxu0 %v160_v27  ;;  %v439_v26 = vld [vmem:[#allocation9 + $0x760] sm:$0xff] }
  0x91   :  { %870 = vmatprep.mubr.f32.mxu1 %v162_v28  ;;  %2183 = vmatpush3.msra.mxu0 %v337_v29  ;;  %v115_v27 = vld [vmem:[#allocation6 + $0x140] sm:$0xff]  ;;  %v117_v28 = vld [vmem:[#allocation6 + $0x150] sm:$0xff]  ;;  %v422_v29 = vld [vmem:[#allocation9 + $0x6d8] sm:$0xff] }
  0x92   :  { %2239 = vmatpush3.msra.mxu1 %v369_v30  ;;  %766 = vmatmul.mubr.f32.gmra.mxu0 %v159_v31  ;;  %v454_v30 = vld [vmem:[#allocation9 + $0x7d8] sm:$0xff] }
  0x93   :  { %871 = vmatmul.mubr.f32.gmra.mxu1 %v161_v32  ;;  %2184 = vmatprep.subr.mxu0 %v352_v33  ;;  %v406_v31 = vld [vmem:[#allocation9 + $0x658] sm:$0xff]  ;;  %v421_v33 = vld [vmem:[#allocation9 + $0x6d0] sm:$0xff] }
  0x94   :  { %2240 = vmatprep.subr.mxu1 %v384_v34  ;;  %2185 = vmatpush3.msra.mxu0 %v336_v35  ;;  %v438_v32 = vld [vmem:[#allocation9 + $0x758] sm:$0xff]  ;;  %v453_v34 = vld [vmem:[#allocation9 + $0x7d0] sm:$0xff]  ;;  %v132_v35 = vld [vmem:[#allocation6 + $0x1c8] sm:$0xff] }
  0x95   :  { %2241 = vmatpush3.msra.mxu1 %v368_v36  ;;  %2186 = vmatprep.subr.mxu0 %v351_v37  ;;  %v134_v36 = vld [vmem:[#allocation6 + $0x1d8] sm:$0xff]  ;;  %v405_v37 = vld [vmem:[#allocation9 + $0x650] sm:$0xff] }
  0x96   :  { %2242 = vmatprep.subr.mxu1 %v383_v38  ;;  %770 = vmatprep.mubr.f32.mxu0 %v176_v39  ;;  %v437_v38 = vld [vmem:[#allocation9 + $0x750] sm:$0xff]  ;;  %v131_v39 = vld [vmem:[#allocation6 + $0x1c0] sm:$0xff] }
  0x97   :  { %875 = vmatprep.mubr.f32.mxu1 %v178_v40  ;;  %2187 = vmatpush3.msra.mxu0 %v335_v41  ;;  %v133_v40 = vld [vmem:[#allocation6 + $0x1d0] sm:$0xff]  ;;  %v420_v41 = vld [vmem:[#allocation9 + $0x6c8] sm:$0xff] }
  0x98   :  { %2243 = vmatpush3.msra.mxu1 %v367_v42  ;;  %771 = vmatmul.mubr.f32.gmra.mxu0 %v175_v43  ;;  %v452_v42 = vld [vmem:[#allocation9 + $0x7c8] sm:$0xff] }
  0x99   :  { %876 = vmatmul.mubr.f32.gmra.mxu1 %v177_v44  ;;  %2188 = vmatprep.subr.mxu0 %v350_v45  ;;  %v404_v43 = vld [vmem:[#allocation9 + $0x648] sm:$0xff]  ;;  %v419_v45 = vld [vmem:[#allocation9 + $0x6c0] sm:$0xff] }
  0x9a   :  { %2244 = vmatprep.subr.mxu1 %v382_v46  ;;  %2189 = vmatpush3.msra.mxu0 %v334_v47  ;;  %v436_v44 = vld [vmem:[#allocation9 + $0x748] sm:$0xff]  ;;  %v451_v46 = vld [vmem:[#allocation9 + $0x7c0] sm:$0xff] }
  0x9b   :  { %2245 = vmatpush3.msra.mxu1 %v366_v48  ;;  %2190 = vmatprep.subr.mxu0 %v349_v49  ;;  %v148_v47 = vld [vmem:[#allocation6 + $0x248] sm:$0xff]  ;;  %v150_v48 = vld [vmem:[#allocation6 + $0x258] sm:$0xff]  ;;  %v403_v49 = vld [vmem:[#allocation9 + $0x640] sm:$0xff] }
  0x9c   :  { %2246 = vmatprep.subr.mxu1 %v381_v50  ;;  %775 = vmatprep.mubr.f32.mxu0 %v192_v51  ;;  %v435_v50 = vld [vmem:[#allocation9 + $0x740] sm:$0xff] }
  0x9d   :  { %880 = vmatprep.mubr.f32.mxu1 %v194_v52  ;;  %2191 = vmatpush3.msra.mxu0 %v333_v53  ;;  %v147_v51 = vld [vmem:[#allocation6 + $0x240] sm:$0xff]  ;;  %v149_v52 = vld [vmem:[#allocation6 + $0x250] sm:$0xff]  ;;  %v418_v53 = vld [vmem:[#allocation9 + $0x6b8] sm:$0xff] }
  0x9e   :  { %2247 = vmatpush3.msra.mxu1 %v365_v54  ;;  %776 = vmatmul.mubr.f32.gmra.mxu0 %v191_v55  ;;  %v450_v54 = vld [vmem:[#allocation9 + $0x7b8] sm:$0xff] }
  0x9f   :  { %881 = vmatmul.mubr.f32.gmra.mxu1 %v193_v56  ;;  %2192 = vmatprep.subr.mxu0 %v348_v57  ;;  %v402_v55 = vld [vmem:[#allocation9 + $0x638] sm:$0xff]  ;;  %v417_v57 = vld [vmem:[#allocation9 + $0x6b0] sm:$0xff] }
  0xa0   :  { %2248 = vmatprep.subr.mxu1 %v380_v58  ;;  %2193 = vmatpush3.msra.mxu0 %v332_v59  ;;  %v434_v56 = vld [vmem:[#allocation9 + $0x738] sm:$0xff]  ;;  %v449_v58 = vld [vmem:[#allocation9 + $0x7b0] sm:$0xff]  ;;  %v164_v59 = vld [vmem:[#allocation6 + $0x2c8] sm:$0xff] }
  0xa1   :  { %2249 = vmatpush3.msra.mxu1 %v364_v60  ;;  %2194 = vmatprep.subr.mxu0 %v347_v61  ;;  %v166_v60 = vld [vmem:[#allocation6 + $0x2d8] sm:$0xff]  ;;  %v401_v61 = vld [vmem:[#allocation9 + $0x630] sm:$0xff] }
  0xa2   :  { %2250 = vmatprep.subr.mxu1 %v379_v62  ;;  %2195 = vmatpush3.msra.mxu0 %v331_v63  ;;  %v433_v62 = vld [vmem:[#allocation9 + $0x730] sm:$0xff]  ;;  %v163_v63 = vld [vmem:[#allocation6 + $0x2c0] sm:$0xff] }
  0xa3   :  { %950 = vmatprep.mubr.f32.mxu0 %v84_v0  ;;  %2251 = vmatpush3.msra.mxu1 %v363_v1  ;;  %v165_v0 = vld [vmem:[#allocation6 + $0x2d0] sm:$0xff]  ;;  %v416_v1 = vld [vmem:[#allocation9 + $0x6a8] sm:$0xff] }
  0xa4   :  { %1055 = vmatprep.mubr.f32.mxu1 %v86_v2  ;;  %951 = vmatmul.mubr.f32.vlgmr.msra.gmra.mxu0 %v83_v3  ;;  %v448_v2 = vld [vmem:[#allocation9 + $0x7a8] sm:$0xff] }
  0xa5   :  { %1056 = vmatmul.mubr.f32.vlgmr.msra.gmra.mxu1 %v85_v4  ;;  %2276 = vmatprep.subr.mxu0 %v426_v5  ;;  %v400_v3 = vld [vmem:[#allocation9 + $0x628] sm:$0xff]  ;;  %v415_v5 = vld [vmem:[#allocation9 + $0x6a0] sm:$0xff] }
  0xa6   :  { %2332 = vmatprep.subr.mxu1 %v458_v6  ;;  %2277 = vmatpush3.msra.mxu0 %v410_v7  ;;  %v432_v4 = vld [vmem:[#allocation9 + $0x728] sm:$0xff]  ;;  %v447_v6 = vld [vmem:[#allocation9 + $0x7a0] sm:$0xff] }
  0xa7   :  { %2333 = vmatpush3.msra.mxu1 %v442_v8  ;;  %2278 = vmatprep.subr.mxu0 %v425_v9  ;;  %v180_v7 = vld [vmem:[#allocation6 + $0x348] sm:$0xff]  ;;  %v182_v8 = vld [vmem:[#allocation6 + $0x358] sm:$0xff]  ;;  %v399_v9 = vld [vmem:[#allocation9 + $0x620] sm:$0xff] }
  0xa8   :  { %2334 = vmatprep.subr.mxu1 %v457_v10  ;;  %955 = vmatprep.mubr.f32.mxu0 %v100_v11  ;;  %v431_v10 = vld [vmem:[#allocation9 + $0x720] sm:$0xff] }
  0xa9   :  { %1060 = vmatprep.mubr.f32.mxu1 %v102_v12  ;;  %2279 = vmatpush3.msra.mxu0 %v409_v13  ;;  %v179_v11 = vld [vmem:[#allocation6 + $0x340] sm:$0xff]  ;;  %v181_v12 = vld [vmem:[#allocation6 + $0x350] sm:$0xff]  ;;  %v414_v13 = vld [vmem:[#allocation9 + $0x698] sm:$0xff] }
  0xaa   :  { %2335 = vmatpush3.msra.mxu1 %v441_v14  ;;  %956 = vmatmul.mubr.f32.gmra.mxu0 %v99_v15  ;;  %v446_v14 = vld [vmem:[#allocation9 + $0x798] sm:$0xff] }
  0xab   :  { %1061 = vmatmul.mubr.f32.gmra.mxu1 %v101_v16  ;;  %2280 = vmatprep.subr.mxu0 %v424_v17  ;;  %v398_v15 = vld [vmem:[#allocation9 + $0x618] sm:$0xff]  ;;  %v413_v17 = vld [vmem:[#allocation9 + $0x690] sm:$0xff] }
  0xac   :  { %2336 = vmatprep.subr.mxu1 %v456_v18  ;;  %2281 = vmatpush3.msra.mxu0 %v408_v19  ;;  %v430_v16 = vld [vmem:[#allocation9 + $0x718] sm:$0xff]  ;;  %v445_v18 = vld [vmem:[#allocation9 + $0x790] sm:$0xff]  ;;  %v196_v19 = vld [vmem:[#allocation6 + $0x3c8] sm:$0xff] }
  0xad   :  { %2337 = vmatpush3.msra.mxu1 %v440_v20  ;;  %2282 = vmatprep.subr.mxu0 %v423_v21  ;;  %v198_v20 = vld [vmem:[#allocation6 + $0x3d8] sm:$0xff]  ;;  %v397_v21 = vld [vmem:[#allocation9 + $0x610] sm:$0xff] }
  0xae   :  { %2338 = vmatprep.subr.mxu1 %v455_v22  ;;  %960 = vmatprep.mubr.f32.mxu0 %v116_v23  ;;  %v429_v22 = vld [vmem:[#allocation9 + $0x710] sm:$0xff]  ;;  %v195_v23 = vld [vmem:[#allocation6 + $0x3c0] sm:$0xff] }
  0xaf   :  { %1065 = vmatprep.mubr.f32.mxu1 %v118_v24  ;;  %2283 = vmatpush3.msra.mxu0 %v407_v25  ;;  %v197_v24 = vld [vmem:[#allocation6 + $0x3d0] sm:$0xff]  ;;  %v412_v25 = vld [vmem:[#allocation9 + $0x688] sm:$0xff] }
  0xb0   :  { %2339 = vmatpush3.msra.mxu1 %v439_v26  ;;  %961 = vmatmul.mubr.f32.gmra.mxu0 %v115_v27  ;;  %v444_v26 = vld [vmem:[#allocation9 + $0x788] sm:$0xff] }
  0xb1   :  { %1066 = vmatmul.mubr.f32.gmra.mxu1 %v117_v28  ;;  %2284 = vmatprep.subr.mxu0 %v422_v29  ;;  %v396_v27 = vld [vmem:[#allocation9 + $0x608] sm:$0xff]  ;;  %v411_v29 = vld [vmem:[#allocation9 + $0x680] sm:$0xff] }
  0xb2   :  { %2340 = vmatprep.subr.mxu1 %v454_v30  ;;  %2285 = vmatpush3.msra.mxu0 %v406_v31  ;;  %v428_v28 = vld [vmem:[#allocation9 + $0x708] sm:$0xff]  ;;  %v443_v30 = vld [vmem:[#allocation9 + $0x780] sm:$0xff] }
  0xb3   :  { %2341 = vmatpush3.msra.mxu1 %v438_v32  ;;  %2286 = vmatprep.subr.mxu0 %v421_v33  ;;  %v395_v31 = vld [vmem:[#allocation9 + $0x600] sm:$0xff]  ;;  %v88_v32 = vld [vmem:[#allocation6 + $0x68] sm:$0xff] }
  0xb4   :  { %2342 = vmatprep.subr.mxu1 %v453_v34  ;;  %965 = vmatprep.mubr.f32.mxu0 %v132_v35  ;;  %v427_v33 = vld [vmem:[#allocation9 + $0x700] sm:$0xff]  ;;  %v90_v34 = vld [vmem:[#allocation6 + $0x78] sm:$0xff] }
  0xb5   :  { %1070 = vmatprep.mubr.f32.mxu1 %v134_v36  ;;  %2287 = vmatpush3.msra.mxu0 %v405_v37  ;;  %v87_v35 = vld [vmem:[#allocation6 + $0x60] sm:$0xff]  ;;  %v89_v36 = vld [vmem:[#allocation6 + $0x70] sm:$0xff]  ;;  %v104_v37 = vld [vmem:[#allocation6 + $0xe8] sm:$0xff] }
  0xb6   :  { %2343 = vmatpush3.msra.mxu1 %v437_v38  ;;  %966 = vmatmul.mubr.f32.gmra.mxu0 %v131_v39  ;;  %v106_v38 = vld [vmem:[#allocation6 + $0xf8] sm:$0xff]  ;;  %v103_v39 = vld [vmem:[#allocation6 + $0xe0] sm:$0xff] }
  0xb7   :  { %1071 = vmatmul.mubr.f32.gmra.mxu1 %v133_v40  ;;  %2288 = vmatprep.subr.mxu0 %v420_v41  ;;  %v105_v40 = vld [vmem:[#allocation6 + $0xf0] sm:$0xff]  ;;  %v120_v41 = vld [vmem:[#allocation6 + $0x168] sm:$0xff] }
  0xb8   :  { %2344 = vmatprep.subr.mxu1 %v452_v42  ;;  %2289 = vmatpush3.msra.mxu0 %v404_v43  ;;  %v122_v42 = vld [vmem:[#allocation6 + $0x178] sm:$0xff]  ;;  %v119_v43 = vld [vmem:[#allocation6 + $0x160] sm:$0xff] }
  0xb9   :  { %2345 = vmatpush3.msra.mxu1 %v436_v44  ;;  %2290 = vmatprep.subr.mxu0 %v419_v45  ;;  %v121_v44 = vld [vmem:[#allocation6 + $0x170] sm:$0xff]  ;;  %v136_v45 = vld [vmem:[#allocation6 + $0x1e8] sm:$0xff] }
  0xba   :  { %2346 = vmatprep.subr.mxu1 %v451_v46  ;;  %970 = vmatprep.mubr.f32.mxu0 %v148_v47  ;;  %v138_v46 = vld [vmem:[#allocation6 + $0x1f8] sm:$0xff]  ;;  %v135_v47 = vld [vmem:[#allocation6 + $0x1e0] sm:$0xff] }
  0xbb   :  { %1075 = vmatprep.mubr.f32.mxu1 %v150_v48  ;;  %2291 = vmatpush3.msra.mxu0 %v403_v49  ;;  %v137_v48 = vld [vmem:[#allocation6 + $0x1f0] sm:$0xff]  ;;  %v152_v49 = vld [vmem:[#allocation6 + $0x268] sm:$0xff] }
  0xbc   :  { %2347 = vmatpush3.msra.mxu1 %v435_v50  ;;  %971 = vmatmul.mubr.f32.gmra.mxu0 %v147_v51  ;;  %v154_v50 = vld [vmem:[#allocation6 + $0x278] sm:$0xff]  ;;  %v151_v51 = vld [vmem:[#allocation6 + $0x260] sm:$0xff] }
  0xbd   :  { %1076 = vmatmul.mubr.f32.gmra.mxu1 %v149_v52  ;;  %2292 = vmatprep.subr.mxu0 %v418_v53  ;;  %v153_v52 = vld [vmem:[#allocation6 + $0x270] sm:$0xff]  ;;  %v168_v53 = vld [vmem:[#allocation6 + $0x2e8] sm:$0xff] }
  0xbe   :  { %2348 = vmatprep.subr.mxu1 %v450_v54  ;;  %2293 = vmatpush3.msra.mxu0 %v402_v55  ;;  %v170_v54 = vld [vmem:[#allocation6 + $0x2f8] sm:$0xff]  ;;  %v167_v55 = vld [vmem:[#allocation6 + $0x2e0] sm:$0xff] }
  0xbf   :  { %2349 = vmatpush3.msra.mxu1 %v434_v56  ;;  %2294 = vmatprep.subr.mxu0 %v417_v57  ;;  %v169_v56 = vld [vmem:[#allocation6 + $0x2f0] sm:$0xff]  ;;  %v184_v57 = vld [vmem:[#allocation6 + $0x368] sm:$0xff] }
  0xc0   :  { %2350 = vmatprep.subr.mxu1 %v449_v58  ;;  %975 = vmatprep.mubr.f32.mxu0 %v164_v59  ;;  %v186_v58 = vld [vmem:[#allocation6 + $0x378] sm:$0xff]  ;;  %v183_v59 = vld [vmem:[#allocation6 + $0x360] sm:$0xff] }
  0xc1   :  { %1080 = vmatprep.mubr.f32.mxu1 %v166_v60  ;;  %2295 = vmatpush3.msra.mxu0 %v401_v61  ;;  %v185_v60 = vld [vmem:[#allocation6 + $0x370] sm:$0xff]  ;;  %v200_v61 = vld [vmem:[#allocation6 + $0x3e8] sm:$0xff] }
  0xc2   :  { %2351 = vmatpush3.msra.mxu1 %v433_v62  ;;  %976 = vmatmul.mubr.f32.gmra.mxu0 %v163_v63  ;;  %v202_v62 = vld [vmem:[#allocation6 + $0x3f8] sm:$0xff]  ;;  %v199_v63 = vld [vmem:[#allocation6 + $0x3e0] sm:$0xff] }
  0xc3   :  { %1081 = vmatmul.mubr.f32.gmra.mxu1 %v165_v0  ;;  %2296 = vmatprep.subr.mxu0 %v416_v1  ;;  %v201_v0 = vld [vmem:[#allocation6 + $0x3f0] sm:$0xff] }
  0xc4   :  { %2352 = vmatprep.subr.mxu1 %v448_v2  ;;  %2297 = vmatpush3.msra.mxu0 %v400_v3  ;;  %v1329_v1 = vld [vmem:[%s3226_s3 + $0x78] sm:$0xff]  ;;  %v1328_v2 = vld [vmem:[%s3226_s3 + $0x70] sm:$0xff]  ;;  %v1327_v3 = vld [vmem:[%s3226_s3 + $0x68] sm:$0xff] }
  0xc5   :  { %2353 = vmatpush3.msra.mxu1 %v432_v4  ;;  %2298 = vmatprep.subr.mxu0 %v415_v5  ;;  %v1326_v4 = vld [vmem:[%s3226_s3 + $0x60] sm:$0xff] }
  0xc6   :  { %2354 = vmatprep.subr.mxu1 %v447_v6  ;;  %980 = vmatprep.mubr.f32.mxu0 %v180_v7  ;;  %v2838_v7 = vld [vmem:[%s3225_s2] ss:$0 sm:$0xff] }
  0xc7   :  { %1085 = vmatprep.mubr.f32.mxu1 %v182_v8  ;;  %2299 = vmatpush3.msra.mxu0 %v399_v9 }
  0xc8   :  { %2355 = vmatpush3.msra.mxu1 %v431_v10  ;;  %981 = vmatmul.mubr.f32.gmra.mxu0 %v179_v11 }
  0xc9   :  { %1086 = vmatmul.mubr.f32.gmra.mxu1 %v181_v12  ;;  %2300 = vmatprep.subr.mxu0 %v414_v13  ;;  %v1325_v13 = vld [vmem:[%s3226_s3 + $0x58] sm:$0xff] }
  0xca   :  { %2356 = vmatprep.subr.mxu1 %v446_v14  ;;  %2301 = vmatpush3.msra.mxu0 %v398_v15  ;;  %v1324_v14 = vld [vmem:[%s3226_s3 + $0x50] sm:$0xff] }
  0xcb   :  { %2357 = vmatpush3.msra.mxu1 %v430_v16  ;;  %2302 = vmatprep.subr.mxu0 %v413_v17 }
  0xcc   :  { %2358 = vmatprep.subr.mxu1 %v445_v18  ;;  %985 = vmatprep.mubr.f32.mxu0 %v196_v19 }
  0xcd   :  { %1090 = vmatprep.mubr.f32.mxu1 %v198_v20  ;;  %2303 = vmatpush3.msra.mxu0 %v397_v21 }
  0xce   :  { %2359 = vmatpush3.msra.mxu1 %v429_v22  ;;  %986 = vmatmul.mubr.f32.gmra.mxu0 %v195_v23  ;;  %v1323_v22 = vld [vmem:[%s3226_s3 + $0x48] sm:$0xff] }
  0xcf   :  { %1091 = vmatmul.mubr.f32.gmra.mxu1 %v197_v24  ;;  %2304 = vmatprep.subr.mxu0 %v412_v25  ;;  %v1322_v24 = vld [vmem:[%s3226_s3 + $0x40] sm:$0xff] }
  0xd0   :  { %2360 = vmatprep.subr.mxu1 %v444_v26  ;;  %2305 = vmatpush3.msra.mxu0 %v396_v27 }
  0xd1   :  { %2361 = vmatpush3.msra.mxu1 %v428_v28  ;;  %2306 = vmatprep.subr.mxu0 %v411_v29 }
  0xd2   :  { %2362 = vmatprep.subr.mxu1 %v443_v30  ;;  %2307 = vmatpush3.msra.mxu0 %v395_v31  ;;  %v1321_v30 = vld [vmem:[%s3226_s3 + $0x38] sm:$0xff] }
  0xd3   :  { %1160 = vmatprep.mubr.f32.mxu0 %v88_v32  ;;  %2363 = vmatpush3.msra.mxu1 %v427_v33  ;;  %v1320_v33 = vld [vmem:[%s3226_s3 + $0x30] sm:$0xff] }
  0xd4   :  { %1265 = vmatprep.mubr.f32.mxu1 %v90_v34  ;;  %1161 = vmatmul.mubr.f32.vlgmr.msra.gmra.mxu0 %v87_v35 }
  0xd5   :  { %1266 = vmatmul.mubr.f32.vlgmr.msra.gmra.mxu1 %v89_v36  ;;  %1165 = vmatprep.mubr.f32.mxu0 %v104_v37  ;;  %v1319_v37 = vld [vmem:[%s3226_s3 + $0x28] sm:$0xff] }
  0xd6   :  { %1270 = vmatprep.mubr.f32.mxu1 %v106_v38  ;;  %2447 = vmatprep.subr.mxu0 %v1329_v1 }
  0xd7   :  { %2448 = vmatpush3.msra.mxu0 %v1329_v1 }
  0xd8   :  { %1166 = vmatmul.mubr.f32.gmra.mxu0 %v103_v39  ;;  %2449 = vmatprep.subr.mxu0 %v1328_v2 }
  0xd9   :  { %1271 = vmatmul.mubr.f32.gmra.mxu1 %v105_v40  ;;  %1170 = vmatprep.mubr.f32.mxu0 %v120_v41  ;;  %v1318_v41 = vld [vmem:[%s3226_s3 + $0x20] sm:$0xff] }
  0xda   :  { %1275 = vmatprep.mubr.f32.mxu1 %v122_v42  ;;  %2450 = vmatpush3.msra.mxu0 %v1328_v2 }
  0xdb   :  { %2451 = vmatprep.subr.mxu0 %v1327_v3 }
  0xdc   :  { %1171 = vmatmul.mubr.f32.gmra.mxu0 %v119_v43 }
  0xdd   :  { %1276 = vmatmul.mubr.f32.gmra.mxu1 %v121_v44  ;;  %1175 = vmatprep.mubr.f32.mxu0 %v136_v45  ;;  %v1317_v44 = vld [vmem:[%s3226_s3 + $0x18] sm:$0xff] }
  0xde   :  { %1280 = vmatprep.mubr.f32.mxu1 %v138_v46  ;;  %2452 = vmatpush3.msra.mxu0 %v1327_v3 }
  0xdf   :  { %2453 = vmatprep.subr.mxu0 %v1326_v4 }
  0xe0   :  { %1176 = vmatmul.mubr.f32.gmra.mxu0 %v135_v47 }
  0xe1   :  { %1281 = vmatmul.mubr.f32.gmra.mxu1 %v137_v48  ;;  %1180 = vmatprep.mubr.f32.mxu0 %v152_v49  ;;  %v1316_v48 = vld [vmem:[%s3226_s3 + $0x10] sm:$0xff] }
  0xe2   :  { %1285 = vmatprep.mubr.f32.mxu1 %v154_v50  ;;  %2454 = vmatpush3.msra.mxu0 %v1326_v4 }
  0xe3   :  { %2455 = vmatprep.subr.mxu0 %v1325_v13 }
  0xe4   :  { %1181 = vmatmul.mubr.f32.gmra.mxu0 %v151_v51 }
  0xe5   :  { %1286 = vmatmul.mubr.f32.gmra.mxu1 %v153_v52  ;;  %1185 = vmatprep.mubr.f32.mxu0 %v168_v53  ;;  %v1315_v52 = vld [vmem:[%s3226_s3 + $0x8] sm:$0xff] }
  0xe6   :  { %1290 = vmatprep.mubr.f32.mxu1 %v170_v54  ;;  %2456 = vmatpush3.msra.mxu0 %v1325_v13 }
  0xe7   :  { %2457 = vmatprep.subr.mxu0 %v1324_v14 }
  0xe8   :  { %1186 = vmatmul.mubr.f32.gmra.mxu0 %v167_v55  ;;  %v1314_v55 = vld [vmem:[%s3226_s3] sm:$0xff] }
  0xe9   :  { %1291 = vmatmul.mubr.f32.gmra.mxu1 %v169_v56  ;;  %1190 = vmatprep.mubr.f32.mxu0 %v184_v57 }
  0xea   :  { %1295 = vmatprep.mubr.f32.mxu1 %v186_v58  ;;  %2458 = vmatpush3.msra.mxu0 %v1324_v14 }
  0xeb   :  { %2459 = vmatprep.subr.mxu0 %v1323_v22 }
  0xec   :  { %1191 = vmatmul.mubr.f32.gmra.mxu0 %v183_v59 }
  0xed   :  { %1296 = vmatmul.mubr.f32.gmra.mxu1 %v185_v60  ;;  %1195 = vmatprep.mubr.f32.mxu0 %v200_v61 }
  0xee   :  { %1300 = vmatprep.mubr.f32.mxu1 %v202_v62  ;;  %2460 = vmatpush3.msra.mxu0 %v1323_v22 }
  0xef   :  { %2461 = vmatprep.subr.mxu0 %v1322_v24 }
  0xf0   :  { %1196 = vmatmul.mubr.f32.gmra.mxu0 %v199_v63 }
  0xf1   :  { %1301 = vmatmul.mubr.f32.gmra.mxu1 %v201_v0  ;;  %2462 = vmatpush3.msra.mxu0 %v1322_v24 }
  0xf2   :  { %2463 = vmatprep.subr.mxu0 %v1321_v30 }
  0xf3   :  { %2464 = vmatpush3.msra.mxu0 %v1321_v30 }
  0xf4   :  { %2465 = vmatprep.subr.mxu0 %v1320_v33 }
  0xf5   :  { %2466 = vmatpush3.msra.mxu0 %v1320_v33 }
  0xf6   :  { %2467 = vmatprep.subr.mxu0 %v1319_v37 }
  0xf7   :  { %2468 = vmatpush3.msra.mxu0 %v1319_v37 }
  0xf8   :  { %2469 = vmatprep.subr.mxu0 %v1318_v41 }
  0xf9   :  { %2470 = vmatpush3.msra.mxu0 %v1318_v41 }
  0xfa   :  { %2471 = vmatprep.subr.mxu0 %v1317_v44 }
  0xfb   :  { %2472 = vmatpush3.msra.mxu0 %v1317_v44 }
  0xfc   :  { %2473 = vmatprep.subr.mxu0 %v1316_v48 }
  0xfd   :  { %2474 = vmatpush3.msra.mxu0 %v1316_v48 }
  0xfe   :  { %2475 = vmatprep.subr.mxu0 %v1315_v52 }
  0xff   :  { %2476 = vmatpush3.msra.mxu0 %v1315_v52 }
 0x100   :  { %2477 = vmatprep.subr.mxu0 %v1314_v55 }
 0x101   :  { %2478 = vmatpush3.msra.mxu0 %v1314_v55 }
 0x104   :  { %v1972_v5 = vpop.f32.mrf.mxu0 }
 0x105   :  { %v2028_v6 = vpop.f32.mrf.mxu1 }
 0x106   :  { %v1973_v8 = vpop.f32.mrf.mxu0 }
 0x107   :  { %v2029_v9 = vpop.f32.mrf.mxu1  ;;  %v1974_v10 = vadd.f32 %v1973_v8, %v1972_v5 }
 0x108   :  { %v2030_v11 = vadd.f32 %v2029_v9, %v2028_v6 }
 0x109   :  { %v533_v12 = vadd.f32 %v1974_v10, %v2838_v7 }
 0x10a   :  { %v1975_v15 = vpop.f32.mrf.mxu0 }
 0x10b   :  { %v2031_v16 = vpop.f32.mrf.mxu1  ;;  %v2847_v17 = vadd.f32 %v2030_v11, %v533_v12 }
 0x10c   :  { %v1976_v18 = vpop.f32.mrf.mxu0 }
 0x10d   :  { %v2032_v19 = vpop.f32.mrf.mxu1  ;;  %v1977_v20 = vadd.f32 %v1976_v18, %v1975_v15 }
 0x10e   :  { %v2033_v21 = vadd.f32 %v2032_v19, %v2031_v16 }
 0x10f   :  { %v538_v23 = vadd.f32 %v1977_v20, %v2838_v7 }
 0x110   :  { %v1978_v25 = vpop.f32.mrf.mxu0 }
 0x111   :  { %v2034_v26 = vpop.f32.mrf.mxu1  ;;  %v2856_v27 = vadd.f32 %v2033_v21, %v538_v23 }
 0x112   :  { %v1979_v28 = vpop.f32.mrf.mxu0 }
 0x113   :  { %v2035_v29 = vpop.f32.mrf.mxu1  ;;  %v1980_v31 = vadd.f32 %v1979_v28, %v1978_v25 }
 0x114   :  { %v2036_v32 = vadd.f32 %v2035_v29, %v2034_v26  ;;  %v3235_v26 = vmov 0.0  }
 0x115   :  { %v543_v34 = vadd.f32 %v1980_v31, %v2838_v7  ;;  %2510 = vmatprep.subr.mxu0 %v3235_v26  ;;  %74 = vst [vmem:[#allocation4] sm:$0x1] %v3235_v26  ;;  %2491 = vmatprep.subr.mxu1 %v3235_v26 }
 0x116   :  { %v1981_v35 = vpop.f32.mrf.mxu0 }
 0x117   :  { %v2037_v36 = vpop.f32.mrf.mxu1  ;;  %v2868_v38 = vadd.f32 %v2036_v32, %v543_v34 }
 0x118   :  { %v1982_v39 = vpop.f32.mrf.mxu0 }
 0x119   :  { %v2038_v40 = vpop.f32.mrf.mxu1  ;;  %v1983_v42 = vadd.f32 %v1982_v39, %v1981_v35 }
 0x11a   :  { %v2039_v43 = vadd.f32 %v2038_v40, %v2037_v36 }
 0x11b   :  { %v548_v45 = vadd.f32 %v1983_v42, %v2838_v7 }
 0x11c   :  { %v1984_v46 = vpop.f32.mrf.mxu0 }
 0x11d   :  { %v2040_v47 = vpop.f32.mrf.mxu1  ;;  %v2880_v49 = vadd.f32 %v2039_v43, %v548_v45 }
 0x11e   :  { %v1985_v50 = vpop.f32.mrf.mxu0 }
 0x11f   :  { %v2041_v51 = vpop.f32.mrf.mxu1  ;;  %v1986_v53 = vadd.f32 %v1985_v50, %v1984_v46 }
 0x120   :  { %v2042_v54 = vadd.f32 %v2041_v51, %v2040_v47 }
 0x121   :  { %v553_v56 = vadd.f32 %v1986_v53, %v2838_v7 }
 0x122   :  { %v1987_v57 = vpop.f32.mrf.mxu0 }
 0x123   :  { %v2043_v58 = vpop.f32.mrf.mxu1  ;;  %v2889_v59 = vadd.f32 %v2042_v54, %v553_v56 }
 0x124   :  { %v1988_v60 = vpop.f32.mrf.mxu0 }
 0x125   :  { %v2044_v61 = vpop.f32.mrf.mxu1  ;;  %v1989_v62 = vadd.f32 %v1988_v60, %v1987_v57 }
 0x126   :  { %v2045_v63 = vadd.f32 %v2044_v61, %v2043_v58 }
 0x127   :  { %v558_v0 = vadd.f32 %v1989_v62, %v2838_v7 }
 0x128   :  { %v1990_v1 = vpop.f32.mrf.mxu0 }
 0x129   :  { %v2046_v2 = vpop.f32.mrf.mxu1  ;;  %v2892_v3 = vadd.f32 %v2045_v63, %v558_v0 }
 0x12a   :  { %v1991_v4 = vpop.f32.mrf.mxu0 }
 0x12b   :  { %v2047_v5 = vpop.f32.mrf.mxu1  ;;  %v1992_v6 = vadd.f32 %v1991_v4, %v1990_v1 }
 0x12c   :  { %v2048_v8 = vadd.f32 %v2047_v5, %v2046_v2 }
 0x12d   :  { %v563_v9 = vadd.f32 %v1992_v6, %v2838_v7 }
 0x12e   :  { %v1993_v10 = vpop.f32.mrf.mxu0 }
 0x12f   :  { %v2049_v11 = vpop.f32.mrf.mxu1  ;;  %v2895_v12 = vadd.f32 %v2048_v8, %v563_v9 }
 0x130   :  { %v1994_v13 = vpop.f32.mrf.mxu0 }
 0x131   :  { %3237 = vst [vmem:[#allocation19_spill] sm:$0xff] %v2895_v12  ;;  %v2050_v14 = vpop.f32.mrf.mxu1  ;;  %v1995_v15 = vadd.f32 %v1994_v13, %v1993_v10 }
 0x132   :  { %v2051_v16 = vadd.f32 %v2050_v14, %v2049_v11 }
 0x133   :  { %v568_v18 = vadd.f32 %v1995_v15, %v2838_v7 }
 0x134   :  { %v2898_v19 = vpop.f32.mrf.mxu0 }
 0x135   :  { %v2900_v20 = vpop.f32.mrf.mxu1  ;;  %v2902_v21 = vadd.f32 %v2051_v16, %v568_v18 }
 0x136   :  { %v2085_v22 = vpop.f32.mrf.mxu0 }
 0x137   :  { %3238 = vst [vmem:[#allocation20_spill] sm:$0xff] %v2902_v21  ;;  %v2904_v23 = vpop.f32.mrf.mxu1  ;;  %v2086_v21 = vadd.f32 %v2085_v22, %v2898_v19 }
 0x13a   :  { %v2087_v24 = vpop.f32.mrf.mxu0 }
 0x13b   :  { %v2906_v25 = vpop.f32.mrf.mxu1 }
 0x13c   :  { %v2088_v7 = vpop.f32.mrf.mxu0 }
 0x13d   :  { %v2911_v28 = vpop.f32.mrf.mxu1 }
 0x140   :  { %v2090_v29 = vpop.f32.mrf.mxu0 }
 0x141   :  { %v2913_v30 = vpop.f32.mrf.mxu1 }
 0x142   :  { %v2091_v31 = vpop.f32.mrf.mxu0 }
 0x143   :  { %v2915_v32 = vpop.f32.mrf.mxu1 }
 0x146   :  { %v2917_v33 = vpop.f32.mrf.mxu0 }
 0x147   :  { %v2919_v34 = vpop.f32.mrf.mxu1 }
 0x148   :  { %v2921_v35 = vpop.f32.mrf.mxu0 }
 0x149   :  { %v2923_v36 = vpop.f32.mrf.mxu1 }
 0x14c   :  { %v2925_v37 = vpop.f32.mrf.mxu0 }
 0x14d   :  { %v2927_v39 = vpop.f32.mrf.mxu1 }
 0x14e   :  { %v2929_v40 = vpop.f32.mrf.mxu0 }
 0x14f   :  { %v2931_v41 = vpop.f32.mrf.mxu1 }
 0x152   :  { %v2933_v42 = vpop.f32.mrf.mxu0 }
 0x153   :  { %v2935_v43 = vpop.f32.mrf.mxu1 }
 0x154   :  { %v2937_v44 = vpop.f32.mrf.mxu0 }
 0x155   :  { %v2939_v45 = vpop.f32.mrf.mxu1 }
 0x158   :  { %v2941_v46 = vpop.f32.mrf.mxu0 }
 0x159   :  { %v2943_v47 = vpop.f32.mrf.mxu1 }
 0x15a   :  { %3239 = vst [vmem:[#allocation21_spill] sm:$0xff] %v2943_v47  ;;  %v2945_v48 = vpop.f32.mrf.mxu0 }
 0x15b   :  { %v2947_v50 = vpop.f32.mrf.mxu1 }
 0x15c   :  { %3240 = vst [vmem:[#allocation22_spill] sm:$0xff] %v2947_v50 }
 0x15e   :  { %v2949_v51 = vpop.f32.mrf.mxu0 }
 0x15f   :  { %3241 = vst [vmem:[#allocation23_spill] sm:$0xff] %v2949_v51  ;;  %v2951_v52 = vpop.f32.mrf.mxu1 }
 0x160   :  { %3242 = vst [vmem:[#allocation24_spill] sm:$0xff] %v2951_v52  ;;  %v2953_v53 = vpop.f32.mrf.mxu0 }
 0x161   :  { %3243 = vst [vmem:[#allocation25_spill] sm:$0xff] %v2953_v53  ;;  %v2955_v54 = vpop.f32.mrf.mxu1 }
 0x162   :  { %3244 = vst [vmem:[#allocation26_spill] sm:$0xff] %v2955_v54 }
 0x164   :  { %v2196_v55 = vpop.f32.mrf.mxu0 }
 0x165   :  { %v2252_v56 = vpop.f32.mrf.mxu1 }
 0x166   :  { %v2197_v57 = vpop.f32.mrf.mxu0 }
 0x167   :  { %v2253_v58 = vpop.f32.mrf.mxu1  ;;  %v2198_v51 = vadd.f32 %v2197_v57, %v2196_v55 }
 0x16a   :  { %v2199_v60 = vpop.f32.mrf.mxu0 }
 0x16b   :  { %v2255_v61 = vpop.f32.mrf.mxu1 }
 0x16c   :  { %v2200_v62 = vpop.f32.mrf.mxu0 }
 0x16d   :  { %v2256_v63 = vpop.f32.mrf.mxu1 }
 0x170   :  { %v2202_v0 = vpop.f32.mrf.mxu0 }
 0x171   :  { %v2957_v1 = vpop.f32.mrf.mxu1 }
 0x172   :  { %v2203_v2 = vpop.f32.mrf.mxu0 }
 0x173   :  { %v2959_v4 = vpop.f32.mrf.mxu1 }
 0x176   :  { %v2205_v5 = vpop.f32.mrf.mxu0 }
 0x177   :  { %v2961_v6 = vpop.f32.mrf.mxu1 }
 0x178   :  { %v2206_v8 = vpop.f32.mrf.mxu0 }
 0x179   :  { %v2963_v9 = vpop.f32.mrf.mxu1 }
 0x17c   :  { %v2965_v10 = vpop.f32.mrf.mxu0 }
 0x17d   :  { %v2967_v11 = vpop.f32.mrf.mxu1 }
 0x17e   :  { %3245 = vst [vmem:[#allocation27_spill] sm:$0xff] %v2967_v11  ;;  %v2969_v13 = vpop.f32.mrf.mxu0  ;;  %v2089_v11 = vadd.f32 %v2088_v7, %v2087_v24  ;;  %v2201_v24 = vadd.f32 %v2200_v62, %v2199_v60  ;;  %v2257_v62 = vadd.f32 %v2256_v63, %v2255_v61 }
 0x17f   :  { %v2971_v14 = vpop.f32.mrf.mxu1 }
 0x180   :  { %3246 = vst [vmem:[#allocation28_spill] sm:$0xff] %v2971_v14  ;;  %v743_v14 = vadd.f32 %v2086_v21, %v2847_v17  ;;  %v748_v22 = vadd.f32 %v2089_v11, %v2856_v27  ;;  %v2145_v17 = vadd.f32 %v2911_v28, %v2906_v25 }
 0x182   :  { %v2973_v15 = vpop.f32.mrf.mxu0 }
 0x183   :  { %v2975_v16 = vpop.f32.mrf.mxu1 }
 0x184   :  { %3247 = vst [vmem:[#allocation29_spill] sm:$0xff] %v2975_v16  ;;  %v2977_v18 = vpop.f32.mrf.mxu0 }
 0x185   :  { %v2979_v26 = vpop.f32.mrf.mxu1 }
 0x186   :  { %3248 = vst [vmem:[#allocation30_spill] sm:$0xff] %v2979_v26  ;;  %v2142_v26 = vadd.f32 %v2904_v23, %v2900_v20  ;;  %v2095_v20 = vadd.f32 %v2921_v35, %v2917_v33  ;;  %v2254_v23 = vadd.f32 %v2253_v58, %v2252_v56 }
 0x188   :  { %v2981_v54 = vpop.f32.mrf.mxu0  ;;  %v848_v19 = vadd.f32 %v2142_v26, %v743_v14  ;;  %v2204_v26 = vadd.f32 %v2203_v2, %v2202_v0  ;;  %v758_v60 = vadd.f32 %v2095_v20, %v2880_v49  ;;  %v2260_v49 = vadd.f32 %v2959_v4, %v2957_v1 }
 0x189   :  { %3249 = vst [vmem:[#allocation31_spill] sm:$0xff] %v2981_v54  ;;  %v2983_v52 = vpop.f32.mrf.mxu1  ;;  %v2092_v54 = vadd.f32 %v2091_v31, %v2090_v29  ;;  %v2148_v29 = vadd.f32 %v2915_v32, %v2913_v30  ;;  %v2151_v30 = vadd.f32 %v2923_v36, %v2919_v34  ;;  %v2213_v20 = vadd.f32 %v2977_v18, %v2973_v15  ;;  %v3258_v15 = vld [vmem:[#allocation28_spill] sm:$0xff] }
 0x18a   :  { %3250 = vst [vmem:[#allocation32_spill] sm:$0xff] %v2983_v52  ;;  %v2986_v50 = vpop.f32.mrf.mxu0  ;;  %v953_v21 = vadd.f32 %v2198_v51, %v848_v19 }
 0x18b   :  { %v2988_v47 = vpop.f32.mrf.mxu1  ;;  %v753_v7 = vadd.f32 %v2092_v54, %v2868_v38  ;;  %v2098_v38 = vadd.f32 %v2929_v40, %v2925_v37  ;;  %v2101_v40 = vadd.f32 %v2937_v44, %v2933_v42  ;;  %v863_v63 = vadd.f32 %v2151_v30, %v758_v60  ;;  %v3260_v60 = vld [vmem:[#allocation22_spill] sm:$0xff] }
 0x18c   :  { %3251 = vst [vmem:[#allocation33_spill] sm:$0xff] %v2988_v47  ;;  %v1058_v55 = vadd.f32 %v2254_v23, %v953_v21  ;;  %v2210_v42 = vadd.f32 %v2969_v13, %v2965_v10  ;;  %v2263_v21 = vadd.f32 %v2963_v9, %v2961_v6  ;;  %v3254_v9 = vld [vmem:[#allocation19_spill] sm:$0xff] }
 0x18d   :  { %v858_v28 = vadd.f32 %v2148_v29, %v753_v7  ;;  %v763_v37 = vadd.f32 %v2098_v38, %v2889_v59  ;;  %v2157_v7 = vadd.f32 %v2939_v45, %v2935_v43 }
 0x18e   :  { %v2991_v53 = vpop.f32.mrf.mxu0 }
 0x18f   :  { %3252 = vst [vmem:[#allocation34_spill] sm:$0xff] %v2991_v53  ;;  %v2993_v16 = vpop.f32.mrf.mxu1  ;;  %v853_v53 = vadd.f32 %v2145_v17, %v748_v22  ;;  %v963_v32 = vadd.f32 %v2204_v26, %v858_v28  ;;  %v768_v22 = vadd.f32 %v2101_v40, %v2892_v3  ;;  %v2104_v17 = vadd.f32 %v2945_v48, %v2941_v46  ;;  %v3263_v40 = vld [vmem:[#allocation29_spill] sm:$0xff] }
 0x190   :  { %3253 = vst [vmem:[#allocation35_spill] sm:$0xff] %v2993_v16  ;;  %v2997_v12 = vpop.f32.mrf.mxu0 }
 0x191   :  { %v2999_v52 = vpop.f32.mrf.mxu1  ;;  %v958_v57 = vadd.f32 %v2201_v24, %v853_v53  ;;  %v2207_v53 = vadd.f32 %v2206_v8, %v2205_v5  ;;  %v2154_v5 = vadd.f32 %v2931_v41, %v2927_v39  ;;  %v1068_v8 = vadd.f32 %v2260_v49, %v963_v32  ;;  %v3264_v49 = vld [vmem:[#allocation30_spill] sm:$0xff] }
 0x192   :  { %v873_v6 = vadd.f32 %v2157_v7, %v768_v22  ;;  %v3268_v7 = vld [vmem:[#allocation32_spill] sm:$0xff] }
 0x193   :  { %v1063_v0 = vadd.f32 %v2257_v62, %v958_v57  ;;  %v968_v59 = vadd.f32 %v2207_v53, %v863_v63  ;;  %v868_v4 = vadd.f32 %v2154_v5, %v763_v37 }
 0x194   :  { %v2308_v16 = vpop.f32.mrf.mxu0 }
 0x195   :  { %v2364_v47 = vpop.f32.mrf.mxu1  ;;  %v1073_v29 = vadd.f32 %v2263_v21, %v968_v59  ;;  %v973_v26 = vadd.f32 %v2210_v42, %v868_v4 }
 0x196   :  { %v2309_v31 = vpop.f32.mrf.mxu0  ;;  %v3267_v22 = vld [vmem:[#allocation34_spill] sm:$0xff] }
 0x197   :  { %v2365_v27 = vpop.f32.mrf.mxu1  ;;  %v2310_v25 = vadd.f32 %v2309_v31, %v2308_v16  ;;  %v773_v31 = vadd.f32 %v2104_v17, %v3254_v9  ;;  %v2219_v17 = vadd.f32 %v2997_v12, %v3267_v22 }
 0x198   :  { %v2311_v51 = vpop.f32.mrf.mxu0  ;;  %v2366_v35 = vadd.f32 %v2365_v27, %v2364_v47  ;;  %v3255_v27 = vld [vmem:[#allocation23_spill] sm:$0xff] }
 0x199   :  { %v2367_v54 = vpop.f32.mrf.mxu1  ;;  %v1163_v33 = vadd.f32 %v2310_v25, %v1058_v55  ;;  %v3256_v55 = vld [vmem:[#allocation25_spill] sm:$0xff]  ;;  %v3257_v25 = vld [vmem:[#allocation27_spill] sm:$0xff] }
 0x19a   :  { %v2312_v56 = vpop.f32.mrf.mxu0  ;;  %v2107_v57 = vadd.f32 %v3256_v55, %v3255_v27  ;;  %v2266_v18 = vadd.f32 %v3258_v15, %v3257_v25 }
 0x19b   :  { %v2368_v58 = vpop.f32.mrf.mxu1  ;;  %v3014_v2 = vadd.f32 %v2366_v35, %v1163_v33  ;;  %v2313_v11 = vadd.f32 %v2312_v56, %v2311_v51  ;;  %v978_v33 = vadd.f32 %v2213_v20, %v873_v6  ;;  %v3261_v56 = vld [vmem:[#allocation31_spill] sm:$0xff]  ;;  %v3269_v20 = vld [vmem:[#allocation33_spill] sm:$0xff] }
 0x19c   :  { %v2314_v47 = vpop.f32.mrf.mxu0  ;;  %v2369_v14 = vadd.f32 %v2368_v58, %v2367_v54  ;;  %v3259_v54 = vld [vmem:[#allocation21_spill] sm:$0xff]  ;;  %v1078_v32 = vadd.f32 %v2266_v18, %v973_v26  ;;  %v2216_v58 = vadd.f32 %v2986_v50, %v3261_v56 }
 0x19d   :  { %v2370_v61 = vpop.f32.mrf.mxu1  ;;  %v1306_v34 = vmax.f32 %v3014_v2, 0.0  ;;  %v1168_v36 = vadd.f32 %v2313_v11, %v1063_v0  ;;  %v2160_v62 = vadd.f32 %v3260_v60, %v3259_v54  ;;  %v3262_v11 = vld [vmem:[#allocation20_spill] sm:$0xff] }
 0x19e   :  { %v2315_v16 = vpop.f32.mrf.mxu0  ;;  %v778_v37 = vadd.f32 %v2107_v57, %v3262_v11 }
 0x19f   :  { %v2371_v19 = vpop.f32.mrf.mxu1  ;;  %v3026_v44 = vadd.f32 %v2369_v14, %v1168_v36  ;;  %v2316_v1 = vadd.f32 %v2315_v16, %v2314_v47  ;;  %2479 = vmatprep.mubr.f32.mxu0 %v1306_v34  ;;  %v2269_v47 = vadd.f32 %v3264_v49, %v3263_v40  ;;  %v878_v36 = vadd.f32 %v2160_v62, %v773_v31  ;;  %v3265_v16 = vld [vmem:[#allocation24_spill] sm:$0xff] }
 0x1a0   :  { %v2317_v39 = vpop.f32.mrf.mxu0  ;;  %v2372_v13 = vadd.f32 %v2371_v19, %v2370_v61  ;;  %v3266_v19 = vld [vmem:[#allocation26_spill] sm:$0xff] }
 0x1a1   :  { %v2373_v41 = vpop.f32.mrf.mxu1  ;;  %v1307_v24 = vmax.f32 %v3026_v44, 0.0  ;;  %v1173_v10 = vadd.f32 %v2316_v1, %v1068_v8  ;;  %v2163_v59 = vadd.f32 %v3266_v19, %v3265_v16  ;;  %v1083_v50 = vadd.f32 %v2269_v47, %v978_v33 }
 0x1a2   :  { %v2318_v23 = vpop.f32.mrf.mxu0  ;;  %v983_v4 = vadd.f32 %v2216_v58, %v878_v36  ;;  %v3271_v58 = vmov 0.0  }
 0x1a3   :  { %v2374_v3 = vpop.f32.mrf.mxu1  ;;  %v3040_v46 = vadd.f32 %v2372_v13, %v1173_v10  ;;  %v2319_v48 = vadd.f32 %v2318_v23, %v2317_v39  ;;  %2480 = vmatmul.mubr.f32.vlgmr.msra.gmra.mxu0 %v1307_v24  ;;  %v883_v21 = vadd.f32 %v2163_v59, %v778_v37  ;;  %v2272_v23 = vadd.f32 %v3269_v20, %v3268_v7  ;;  %v1921_v37 = vld [vmem:[%s3227_s4] ss:$0 sm:$0xff]  ;;  %s2747_s4 = smov 64  }
 0x1a4   :  { %v2320_v43 = vpop.f32.mrf.mxu0  ;;  %v2375_v51 = vadd.f32 %v2374_v3, %v2373_v41  ;;  %2507 = vmatprep.mubr.msk.f32.mxu1 %vm2748_vm0, %v3271_v58  ;;  %73 = vst.msk [vmem:[#allocation3] sm:$0x1] %vm71_vm2, %v3271_v58 }
 0x1a5   :  { %v2376_v45 = vpop.f32.mrf.mxu1  ;;  %v1308_v28 = vmax.f32 %v3040_v46, 0.0  ;;  %v1178_v38 = vadd.f32 %v2319_v48, %v1073_v29  ;;  %v1088_v9 = vadd.f32 %v2272_v23, %v983_v4  ;;  %v988_v31 = vadd.f32 %v2219_v17, %v883_v21 }
 0x1a6   :  { %v2321_v35 = vpop.f32.mrf.mxu0 }
 0x1a7   :  { %v2377_v30 = vpop.f32.mrf.mxu1  ;;  %v1283_v0 = vadd.f32 %v2375_v51, %v1178_v38  ;;  %v2322_v53 = vadd.f32 %v2321_v35, %v2320_v43  ;;  %2482 = vmatprep.mubr.f32.mxu0 %v1308_v28  ;;  %v3270_v43 = vld [vmem:[#allocation35_spill] sm:$0xff] }
 0x1a8   :  { %v2323_v61 = vpop.f32.mrf.mxu0  ;;  %v2378_v8 = vadd.f32 %v2377_v30, %v2376_v45  ;;  %v2275_v45 = vadd.f32 %v2999_v52, %v3270_v43 }
 0x1a9   :  { %v2379_v63 = vpop.f32.mrf.mxu1  ;;  %v1309_v14 = vmax.f32 %v1283_v0, 0.0  ;;  %v1183_v5 = vadd.f32 %v2322_v53, %v1078_v32 }
 0x1aa   :  { %v2324_v42 = vpop.f32.mrf.mxu0  ;;  %v1093_v54 = vadd.f32 %v2275_v45, %v988_v31  ;;  %v1539_v45 = vld [vmem:[#allocation5] sm:$0x1] }
 0x1ab   :  { %v2380_v1 = vpop.f32.mrf.mxu1  ;;  %v1288_v39 = vadd.f32 %v2378_v8, %v1183_v5  ;;  %v2325_v41 = vadd.f32 %v2324_v42, %v2323_v61  ;;  %2483 = vmatmul.mubr.f32.gmra.mxu0 %v1309_v14 }
 0x1ac   :  { %v2326_v10 = vpop.f32.mrf.mxu0  ;;  %v2381_v26 = vadd.f32 %v2380_v1, %v2379_v63 }
 0x1ad   :  { %v2382_v13 = vpop.f32.mrf.mxu1  ;;  %v1310_v3 = vmax.f32 %v1288_v39, 0.0  ;;  %v1188_v29 = vadd.f32 %v2325_v41, %v1083_v50 }
 0x1ae   :  { %v2327_v48 = vpop.f32.mrf.mxu0 }
 0x1af   :  { %v2383_v6 = vpop.f32.mrf.mxu1  ;;  %v1293_v27 = vadd.f32 %v2381_v26, %v1188_v29  ;;  %v2328_v55 = vadd.f32 %v2327_v48, %v2326_v10  ;;  %2485 = vmatprep.mubr.f32.mxu0 %v1310_v3 }
 0x1b0   :  { %v2329_v12 = vpop.f32.mrf.mxu0  ;;  %v2384_v18 = vadd.f32 %v2383_v6, %v2382_v13 }
 0x1b1   :  { %v2385_v57 = vpop.f32.mrf.mxu1  ;;  %v1311_v25 = vmax.f32 %v1293_v27, 0.0  ;;  %v1193_v15 = vadd.f32 %v2328_v55, %v1088_v9 }
 0x1b2   :  { %v2330_v38 = vpop.f32.mrf.mxu0 }
 0x1b3   :  { %v2386_v51 = vpop.f32.mrf.mxu1  ;;  %v1298_v60 = vadd.f32 %v2384_v18, %v1193_v15  ;;  %v2331_v62 = vadd.f32 %v2330_v38, %v2329_v12  ;;  %2486 = vmatmul.mubr.f32.gmra.mxu0 %v1311_v25 }
 0x1b4   :  { %v2387_v30 = vadd.f32 %v2386_v51, %v2385_v57 }
 0x1b5   :  { %v1312_v33 = vmax.f32 %v1298_v60, 0.0  ;;  %v1198_v35 = vadd.f32 %v2331_v62, %v1093_v54 }
 0x1b7   :  { %v1303_v32 = vadd.f32 %v2387_v30, %v1198_v35  ;;  %2488 = vmatprep.mubr.f32.mxu0 %v1312_v33 }
 0x1b9   :  { %v1313_v56 = vmax.f32 %v1303_v32, 0.0 }
 0x1bb   :  { %2489 = vmatmul.mubr.f32.gmra.mxu0 %v1313_v56 }
 0x1bc   :  { %2511 = vmatpush3.msra.mxu0 %v1313_v56  ;;  %2526 = vmatprep.mubr.msk.f32.mxu0 %vm2748_vm0, %v3271_v58 }
 0x1bd   :  { %2512 = vmatprep.subr.mxu0 %v3271_v58 }
 0x1be   :  { %2513 = vmatpush3.msra.mxu0 %v1312_v33 }
 0x1bf   :  { %2514 = vmatprep.subr.mxu0 %v3271_v58 }
 0x1c0   :  { %2515 = vmatpush3.msra.mxu0 %v1311_v25  ;;  %v2749_v25 = vmov 0  }
 0x1c1   :  { %2516 = vmatprep.subr.mxu0 %v3271_v58  ;;  %2577 = vset.pattern.permute.xlu0 %v2749_v25 }
 0x1c2   :  { %2517 = vmatpush3.msra.mxu0 %v1310_v3  ;;  %2578 = vset.pattern.permute.xlu1 %v2749_v25  ;;  %v1790_v25 = vld [vmem:[%s3230_s7 + $0x10] sm:$0xff] }
 0x1c3   :  { %2518 = vmatprep.subr.mxu0 %v3271_v58 }
 0x1c4   :  { %2519 = vmatpush3.msra.mxu0 %v1309_v14 }
 0x1c5   :  { %2520 = vmatprep.subr.mxu0 %v3271_v58 }
 0x1c6   :  { %2521 = vmatpush3.msra.mxu0 %v1308_v28 }
 0x1c7   :  { %2522 = vmatprep.subr.mxu0 %v3271_v58 }
 0x1c8   :  { %2523 = vmatpush3.msra.mxu0 %v1307_v24 }
 0x1c9   :  { %2524 = vmatprep.subr.mxu0 %v3271_v58 }
 0x1ca   :  { %2525 = vmatpush3.msra.mxu0 %v1306_v34 }
 0x263   :  { %v2481_v52 = vpop.f32.mrf.mxu0 }
 0x264   :  { %v3097_v19 = vadd.f32 %v2481_v52, %v1921_v37 }
 0x265   :  { %v1403_v0 = vpop.f32.mrf.mxu0 }
 0x266   :  { %v3091_v34 = vadd.f32 %v1921_v37, %v1403_v0  ;;  %v1923_v42 = vmul.f32 -1.442695, %v3097_v19 }
 0x268   :  { %v1922_v63 = vmul.f32 -1.442695, %v3091_v34 }
 0x26b   :  { %v2484_v53 = vpop.f32.mrf.mxu0 }
 0x26c   :  { %v3095_v14 = vadd.f32 %v2484_v53, %v1921_v37 }
 0x26d   :  { %v1413_v11 = vpop.f32.mrf.mxu0 }
 0x26e   :  { %v3083_v46 = vadd.f32 %v1921_v37, %v1413_v11  ;;  %v1925_v50 = vmul.f32 -1.442695, %v3095_v14 }
 0x270   :  { %v1924_v2 = vmul.f32 -1.442695, %v3083_v46 }
 0x273   :  { %v2487_v28 = vpop.f32.mrf.mxu0 }
 0x274   :  { %v3085_v40 = vadd.f32 %v2487_v28, %v1921_v37 }
 0x275   :  { %v1423_v44 = vpop.f32.mrf.mxu0 }
 0x276   :  { %v1927_v24 = vmul.f32 -1.442695, %v3085_v40  ;;  %v3088_v49 = vadd.f32 %v1921_v37, %v1423_v44 }
 0x278   :  { %v1926_v47 = vmul.f32 -1.442695, %v3088_v49  ;;  %2579 = vpow2.f32 %v1927_v24 }
 0x279   :  { %2581 = vpow2.f32 %v1924_v2 }
 0x27a   :  { %2583 = vpow2.f32 %v1926_v47  ;;  %v2750_v47 = vmov -inf  }
 0x27b   :  { %v2490_v61 = vpop.f32.mrf.mxu0  ;;  %2585 = vpow2.f32 %v1922_v63  ;;  %72 = vst.msk [vmem:[#allocation2] sm:$0x1] %vm71_vm2, %v2750_v47 }
 0x27c   :  { %v1439_v36 = vadd.f32 %v2490_v61, %v1921_v37  ;;  %v1545_v61 = vlaneseq }
 0x27d   :  { %v1433_v5 = vpop.f32.mrf.mxu0 }
 0x27e   :  { %v1929_v8 = vmul.f32 -1.442695, %v1439_v36  ;;  %v1434_v16 = vadd.f32 %v1921_v37, %v1433_v5  ;;  %v1546_v63 = vshrl.u32 %v1545_v61, 7  ;;  %v1648_v5 = vand.u32 127, %v1545_v61 }
 0x280   :  { %v1928_v59 = vmul.f32 -1.442695, %v1434_v16  ;;  %2587 = vpow2.f32 %v1929_v8  ;;  %vm1652_vm3 = vcmp.lt.s32.totalorder %v1648_v5, 64 }
 0x282   :  { %2589 = vpow2.f32 %v1928_v59 }
 0x283   :  { %2591 = vpow2.f32 %v1925_v50 }
 0x284   :  { %2593 = vpow2.f32 %v1923_v42 }
 0x285   :  { %v2580_v1 = vpop.eup %2579 }
 0x286   :  { %v1479_v4 = vadd.f32 1.0, %v2580_v1  ;;  %v2582_v22 = vpop.eup %2581  ;;  %v1656_v1 = vld [vmem:[#allocation2] sm:$0x1] }
 0x287   :  { %v2584_v17 = vpop.eup %2583  ;;  %v1476_v41 = vadd.f32 1.0, %v2582_v22 }
 0x288   :  { %2595 = vrcp.f32 %v1479_v4  ;;  %v1478_v39 = vadd.f32 1.0, %v2584_v17  ;;  %v2586_v21 = vpop.eup %2585 }
 0x289   :  { %v1474_v7 = vadd.f32 1.0, %v2586_v21 }
 0x28a   :  { %2597 = vrcp.f32 %v1478_v39 }
 0x28b   :  { %2599 = vrcp.f32 %v1476_v41 }
 0x28d   :  { %v2588_v10 = vpop.eup %2587 }
 0x28e   :  { %v1481_v13 = vadd.f32 1.0, %v2588_v10 }
 0x28f   :  { %v2590_v20 = vpop.eup %2589 }
 0x290   :  { %2601 = vrcp.f32 %v1481_v13  ;;  %v2592_v23 = vpop.eup %2591  ;;  %v1480_v3 = vadd.f32 1.0, %v2590_v20 }
 0x291   :  { %2603 = vrcp.f32 %v1474_v7  ;;  %v2594_v29 = vpop.eup %2593  ;;  %v1477_v26 = vadd.f32 1.0, %v2592_v23 }
 0x292   :  { %2605 = vrcp.f32 %v1480_v3  ;;  %v1475_v6 = vadd.f32 1.0, %v2594_v29  ;;  %v1803_v3 = vld [vmem:[%s3230_s7 + $0x78] sm:$0xff]  ;;  %v1802_v29 = vld [vmem:[%s3230_s7 + $0x70] sm:$0xff] }
 0x293   :  { %2607 = vrcp.f32 %v1477_v26  ;;  %v1801_v26 = vld [vmem:[%s3230_s7 + $0x68] sm:$0xff] }
 0x294   :  { %2609 = vrcp.f32 %v1475_v6  ;;  %v1799_v6 = vld [vmem:[%s3230_s7 + $0x58] sm:$0xff] }
 0x295   :  { %v2596_v48 = vpop.eup %2595  ;;  %2611 = vtanh.f32 %v1439_v36  ;;  %v3136_v36 = vsub.s32 0, %v1546_v63 }
 0x296   :  { %1516 = vrot.lane.b32.xlu1 %v2596_v48, %s2747_s4  ;;  %2613 = vtanh.f32 %v1434_v16  ;;  %v1800_v48 = vld [vmem:[%s3230_s7 + $0x60] sm:$0xff] }
 0x297   :  { %v2598_v9 = vpop.eup %2597  ;;  %2615 = vtanh.f32 %v3085_v40 }
 0x298   :  { %v2600_v31 = vpop.eup %2599  ;;  %2617 = vtanh.f32 %v3088_v49 }
 0x299   :  { %2619 = vtanh.f32 %v3095_v14 }
 0x29a   :  { %1514 = vrot.lane.b32.xlu1 %v2598_v9, %s2747_s4  ;;  %2621 = vtanh.f32 %v3083_v46  ;;  %v1798_v9 = vld [vmem:[%s3230_s7 + $0x50] sm:$0xff] }
 0x29b   :  { %2623 = vtanh.f32 %v3097_v19 }
 0x29c   :  { %2625 = vtanh.f32 %v3091_v34  ;;  %v1538_v34 = vld [vmem:[%s3228_s5] sm:$0x1] }
 0x29d   :  { %v2602_v27 = vpop.eup %2601 }
 0x29e   :  { %1520 = vrot.lane.b32.xlu0 %v2602_v27, %s2747_s4  ;;  %1510 = vrot.lane.b32.xlu1 %v2600_v31, %s2747_s4  ;;  %v2604_v55 = vpop.eup %2603  ;;  %v1797_v31 = vld [vmem:[%s3230_s7 + $0x48] sm:$0xff]  ;;  %v1796_v27 = vld [vmem:[%s3230_s7 + $0x40] sm:$0xff] }
 0x29f   :  { %v2606_v12 = vpop.eup %2605 }
 0x2a0   :  { %v2608_v57 = vpop.eup %2607 }
 0x2a1   :  { %v2610_v43 = vpop.eup %2609 }
 0x2a2   :  { %1518 = vrot.lane.b32.xlu0 %v2606_v12, %s2747_s4  ;;  %1506 = vrot.lane.b32.xlu1 %v2604_v55, %s2747_s4  ;;  %v2612_v15 = vpop.eup %2611  ;;  %v1795_v55 = vld [vmem:[%s3230_s7 + $0x38] sm:$0xff]  ;;  %v1794_v12 = vld [vmem:[%s3230_s7 + $0x30] sm:$0xff] }
 0x2a3   :  { %v2614_v51 = vpop.eup %2613 }
 0x2a4   :  { %v2616_v33 = vpop.eup %2615 }
 0x2a5   :  { %v2618_v32 = vpop.eup %2617 }
 0x2a6   :  { %1512 = vrot.lane.b32.xlu0 %v2608_v57, %s2747_s4  ;;  %v2620_v0 = vpop.eup %2619  ;;  %v1793_v57 = vld [vmem:[%s3230_s7 + $0x28] sm:$0xff] }
 0x2a7   :  { %v2622_v37 = vpop.eup %2621 }
 0x2a8   :  { %v2624_v40 = vpop.eup %2623 }
 0x2a9   :  { %v2626_v49 = vpop.eup %2625 }
 0x2aa   :  { %1508 = vrot.lane.b32.xlu0 %v2610_v43, %s2747_s4  ;;  %v1792_v43 = vld [vmem:[%s3230_s7 + $0x20] sm:$0xff] }
 0x2ae   :  { %1542 = vperm.xlu0 %2577, %v1539_v45   ;;  %v1791_v45 = vld [vmem:[%s3230_s7 + $0x18] sm:$0xff] }
 0x308   :  { %v1517_v54 = vpop.permute.xlu1 %1516 }
 0x309   :  { %v1535_v35 = vmul.f32 %v2616_v33, %v1517_v54  ;;  %v1788_v33 = vld [vmem:[%s3230_s7] sm:$0xff] }
 0x30c   :  { %v1515_v30 = vpop.permute.xlu1 %1514 }
 0x30d   :  { %v1534_v56 = vmul.f32 %v2618_v32, %v1515_v30  ;;  %v1684_v32 = vld [vmem:[#allocation4] sm:$0x1] }
 0x310   :  { %v1521_v18 = vpop.permute.xlu0 %1520  ;;  %v1511_v11 = vpop.permute.xlu1 %1510 }
 0x311   :  { %v1537_v38 = vmul.f32 %v2612_v15, %v1521_v18  ;;  %v1532_v46 = vmul.f32 %v2622_v37, %v1511_v11  ;;  %v1676_v15 = vld [vmem:[#allocation3] sm:$0x1] }
 0x313   :  { %2492 = vmatpush3.xpose.msk.msra.mxu1 %vm1549_vm1, %v1537_v38 }
 0x314   :  { %v1519_v60 = vpop.permute.xlu0 %1518  ;;  %2493 = vmatprep.subr.mxu1 %v3271_v58  ;;  %v1507_v24 = vpop.permute.xlu1 %1506 }
 0x315   :  { %v1536_v62 = vmul.f32 %v2614_v51, %v1519_v60  ;;  %v1530_v2 = vmul.f32 %v2626_v49, %v1507_v24  ;;  %v1789_v60 = vld [vmem:[%s3230_s7 + $0x8] sm:$0xff]  ;;  %s2752_s7 = smov [#allocation11]  }
 0x316   :  { %s1883_s29 = sshll.u32 %s2752_s7, 4  ;;  %s1884_s29 = int_to_ptr.vmem [resolvable:$true] %s1883_s29 }
 0x317   :  { %2494 = vmatpush3.xpose.msk.msra.mxu1 %vm1549_vm1, %v1536_v62 }
 0x318   :  { %2495 = vmatprep.subr.mxu1 %v3271_v58  ;;  %v1513_v52 = vpop.permute.xlu0 %1512 }
 0x319   :  { %v1533_v53 = vmul.f32 %v2620_v0, %v1513_v52 }
 0x31b   :  { %2496 = vmatpush3.xpose.msk.msra.mxu1 %vm1549_vm1, %v1535_v35 }
 0x31c   :  { %2497 = vmatprep.subr.mxu1 %v3271_v58  ;;  %v1509_v28 = vpop.permute.xlu0 %1508 }
 0x31d   :  { %v1531_v44 = vmul.f32 %v2624_v40, %v1509_v28 }
 0x31f   :  { %2498 = vmatpush3.xpose.msk.msra.mxu1 %vm1549_vm1, %v1534_v56 }
 0x320   :  { %2499 = vmatprep.subr.mxu1 %v3271_v58 }
 0x323   :  { %2500 = vmatpush3.xpose.msk.msra.mxu1 %vm1549_vm1, %v1533_v53 }
 0x324   :  { %2501 = vmatprep.subr.mxu1 %v3271_v58 }
 0x327   :  { %2502 = vmatpush3.xpose.msk.msra.mxu1 %vm1549_vm1, %v1532_v46 }
 0x328   :  { %2503 = vmatprep.subr.mxu1 %v3271_v58 }
 0x329   :  { %v1543_v14 = vpop.permute.xlu0 %1542 }
 0x32a   :  { %v1548_v8 = vrot.slane %v1543_v14, %v3136_v36 }
 0x32b   :  { %2504 = vmatpush3.xpose.msk.msra.mxu1 %vm1549_vm1, %v1531_v44 }
 0x32c   :  { %2505 = vmatprep.subr.mxu1 %v3271_v58 }
 0x32f   :  { %2506 = vmatpush3.xpose.msk.msra.mxu1 %vm1549_vm1, %v1530_v2 }
 0x330   :  { %2529 = vmatprep.subr.mxu1 %v3271_v58 }
 0x332   :  { %2508 = vmatmul.mubr.msk.f32.vlgmr.msra.gmra.mxu1 %vm1549_vm1, %v1538_v34 }
 0x333   :  { %2561 = vmatprep.mubr.msk.f32.mxu1 %vm2748_vm0, %v3271_v58  ;;  %2530 = vmatpush3.msra.mxu1 %v1803_v3 }
 0x334   :  { %2531 = vmatprep.subr.mxu1 %v3271_v58 }
 0x335   :  { %2532 = vmatpush3.msra.mxu1 %v1802_v29 }
 0x336   :  { %2533 = vmatprep.subr.mxu1 %v3271_v58 }
 0x337   :  { %2534 = vmatpush3.msra.mxu1 %v1801_v26 }
 0x338   :  { %2535 = vmatprep.subr.mxu1 %v3271_v58 }
 0x339   :  { %2536 = vmatpush3.msra.mxu1 %v1800_v48 }
 0x33a   :  { %2537 = vmatprep.subr.mxu1 %v3271_v58 }
 0x33b   :  { %2538 = vmatpush3.msra.mxu1 %v1799_v6 }
 0x33c   :  { %2539 = vmatprep.subr.mxu1 %v3271_v58 }
 0x33d   :  { %2540 = vmatpush3.msra.mxu1 %v1798_v9 }
 0x33e   :  { %2541 = vmatprep.subr.mxu1 %v3271_v58 }
 0x33f   :  { %2542 = vmatpush3.msra.mxu1 %v1797_v31 }
 0x340   :  { %2543 = vmatprep.subr.mxu1 %v3271_v58 }
 0x341   :  { %2544 = vmatpush3.msra.mxu1 %v1796_v27 }
 0x342   :  { %2545 = vmatprep.subr.mxu1 %v3271_v58 }
 0x343   :  { %2546 = vmatpush3.msra.mxu1 %v1795_v55 }
 0x344   :  { %2547 = vmatprep.subr.mxu1 %v3271_v58 }
 0x345   :  { %2548 = vmatpush3.msra.mxu1 %v1794_v12 }
 0x346   :  { %2549 = vmatprep.subr.mxu1 %v3271_v58 }
 0x347   :  { %2550 = vmatpush3.msra.mxu1 %v1793_v57 }
 0x348   :  { %2551 = vmatprep.subr.mxu1 %v3271_v58 }
 0x349   :  { %2552 = vmatpush3.msra.mxu1 %v1792_v43 }
 0x34a   :  { %2553 = vmatprep.subr.mxu1 %v3271_v58 }
 0x34b   :  { %2554 = vmatpush3.msra.mxu1 %v1791_v45 }
 0x34c   :  { %2555 = vmatprep.subr.mxu1 %v3271_v58 }
 0x34d   :  { %2556 = vmatpush3.msra.mxu1 %v1790_v25 }
 0x34e   :  { %2557 = vmatprep.subr.mxu1 %v3271_v58 }
 0x34f   :  { %2558 = vmatpush3.msra.mxu1 %v1789_v60 }
 0x350   :  { %2559 = vmatprep.subr.mxu1 %v3271_v58 }
 0x351   :  { %2560 = vmatpush3.msra.mxu1 %v1788_v33 }
 0x3f2   :  { %v1643_v16 = vpop.f32.mrf.mxu1 }
 0x3f3   :  { %v1644_v19 = vadd.f32 %v1643_v16, %v1548_v8 }
 0x3f4   :  { %v2509_v59 = vpop.f32.mrf.mxu1 }
 0x3f5   :  { %v1653_v50 = vsel %vm1652_vm3, %v1644_v19, -inf }
 0x3f6   :  { %v1657_v42 = vsel %vm1654_vm4, %v1653_v50, -inf  ;;  %1655 = vst.msk [vmem:[#allocation11] sm:$0x1] %vm1654_vm4, %v1653_v50 }
 0x3f7   :  { %1658 = vmax.xlane.f32.xlu1 %v1657_v42 }
 0x480   :  { %v1659_v4 = vpop.xlane.xlu1 %1658 }
 0x481   :  { %v1660_v22 = vmax.f32 %v1656_v1, %v1659_v4 }
 0x483   :  { %v1661_v17 = vsub.f32 %v1656_v1, %v1660_v22  ;;  %1770 = vst.msk [vmem:[#allocation2] sm:$0x1] %vm71_vm2, %v1660_v22  ;;  %1666 = vperm.xlu0 %2577, %v1660_v22  }
 0x485   :  { %v1662_v39 = vmul.f32 1.442695, %v1661_v17 }
 0x487   :  { %2627 = vpow2.f32 %v1662_v39 }
 0x494   :  { %v2628_v41 = vpop.eup %2627 }
 0x495   :  { %1687 = vperm.xlu1 %2578, %v2628_v41   ;;  %v1677_v18 = vmul.f32 %v2628_v41, %v1676_v15 }
 0x4fe   :  { %v1667_v21 = vpop.permute.xlu0 %1666 }
 0x4ff   :  { %v1672_v10 = vrot.slane %v1667_v21, %v3136_v36 }
 0x501   :  { %v1673_v13 = vsub.f32 %v1653_v50, %v1672_v10 }
 0x503   :  { %v1674_v7 = vmul.f32 1.442695, %v1673_v13 }
 0x505   :  { %2629 = vpow2.f32 %v1674_v7 }
 0x510   :  { %v1688_v35 = vpop.permute.xlu1 %1687 }
 0x511   :  { %v1693_v30 = vrot.slane %v1688_v35, %v3136_v36 }
 0x512   :  { %v2630_v20 = vpop.eup %2629 }
 0x513   :  { %2527 = vmatmul.mubr.msk.f32.vlgmr.msra.gmra.mxu0 %vm1549_vm1, %v2630_v20  ;;  %v1678_v23 = vsel %vm1654_vm4, %v2630_v20, 0.0  ;;  %v1694_v56 = vmul.f32 %v1693_v30, %v1684_v32 }
 0x514   :  { %1679 = vadd.xlane.f32.xlu0 %v1678_v23 }
 0x59d   :  { %v1680_v38 = vpop.xlane.xlu0 %1679 }
 0x59e   :  { %v1681_v51 = vadd.f32 %v1680_v38, %v1677_v18 }
 0x5a0   :  { %1683 = vst.msk [vmem:[#allocation3] sm:$0x1] %vm71_vm2, %v1681_v51 }
 0x5a7   :  { %v1774_v54 = vld [vmem:[#allocation3] sm:$0x1] }
 0x5a8   :  { %2631 = vrcp.f32 %v1774_v54 }
 0x5b5   :  { %v2632_v62 = vpop.eup %2631 }
 0x5b6   :  { %1779 = vperm.xlu0 %2577, %v2632_v62  }
 0x5d3   :  { %v1764_v52 = vpop.f32.mrf.mxu0 }
 0x5d4   :  { %v1768_v0 = vadd.f32 %v1764_v52, %v1694_v56 }
 0x5d5   :  { %v2528_v53 = vpop.f32.mrf.mxu0 }
 0x5d6   :  { %1769 = vst [vmem:[#allocation4] sm:$0x1] %v1768_v0 }
 0x5dd   :  { %v1776_v46 = vld [vmem:[#allocation4] sm:$0x1] }
 0x631   :  { %v1780_v11 = vpop.permute.xlu0 %1779 }
 0x632   :  { %v1785_v37 = vrot.slane %v1780_v11, %v3136_v36 }
 0x634   :  { %v1786_v28 = vmul.f32 %v1785_v37, %v1776_v46 }
 0x636   :  { %1787 = vst [vmem:[#allocation12] sm:$0x1] %v1786_v28  ;;  %2562 = vmatmul.mubr.f32.vlgmr.msra.gmra.mxu1 %v1786_v28 }
 0x637   :  { %2684 = shalt.err (!%p2681_p0)
}
 0x638   :  { %1896 = dma.vmem_to_hbm [thread:$0]  %s1894_s28, 16, %s3233_s10, [#allocation13]  }
 0x639   :  { %s2693_s13 = scalar_lea.vmem %s1884_s29, 16  ;;  %s2697_s14 = scalar_lea.vmem %s1884_s29, 32 }
 0x63a   :  { %p2694_p1 = scmp.ne.s32.totalorder %s1884_s29, %s2693_s13  ;;  %p2698_p2 = scmp.lt.s32.totalorder %s1884_s29, %s1884_s29 }
 0x63b   :  { %p2699_p3 = scmp.lt.s32.totalorder %s2697_s14, %s2693_s13 }
 0x63d   :  { %p2700_p4 = por %p2699_p3, %p2698_p2 }
 0x63f   :  { %p2701_p5 = pnand %p2700_p4, %p2694_p1 }
 0x641   :  { %2704 = shalt.err (!%p2701_p5)
}
 0x642   :  { %1886 = dma.vmem_to_hbm [thread:$0]  %s1884_s29, 16, %s3232_s9, [#allocation8]   ;;  %v1804_v58 = vld [vmem:[%s3231_s8] sm:$0x1]  ;;  %vm1875_vm5 = vcmask 8192  }
 0x643   :  { %s2753_s19 = smov [#allocation14]  }
 0x644   :  { %s1903_s20 = sshll.u32 %s2753_s19, 4  ;;  %s1904_s20 = int_to_ptr.vmem [resolvable:$true] %s1903_s20 }
 0x645   :  { %s2713_s10 = scalar_lea.vmem %s1904_s20, 16  ;;  %s2717_s3 = scalar_lea.vmem %s1904_s20, 32 }
 0x646   :  { %p2714_p6 = scmp.ne.s32.totalorder %s1904_s20, %s2713_s10  ;;  %p2718_p7 = scmp.lt.s32.totalorder %s1904_s20, %s1904_s20 }
 0x647   :  { %p2719_p8 = scmp.lt.s32.totalorder %s2717_s3, %s2713_s10 }
 0x649   :  { %p2720_p9 = por %p2719_p8, %p2718_p7 }
 0x64b   :  { %p2721_p10 = pnand %p2720_p9, %p2714_p6 }
 0x6f6   :  { %v1871_v40 = vpop.f32.mrf.mxu1 }
 0x6f7   :  { %v1872_v44 = vadd.f32 %v1871_v40, %v1804_v58 }
 0x6f8   :  { %v2563_v24 = vpop.f32.mrf.mxu1 }
 0x6f9   :  { %1876 = vst.msk [vmem:[#allocation14] sm:$0x1] %vm1875_vm5, %v1872_v44 }
 0x6fa   :  { %2724 = shalt.err (!%p2721_p10)
}
 0x6fb   :  { %1906 = dma.vmem_to_hbm [thread:$0]  %s1904_s20, 16, %s3234_s11, [#allocation13]  }
 0x6fc   :  { %2737 = dma.done.wait [#allocation8], 16  }
 0x6fd   :  { %2738 = vsyncadd [#allocation8], 4294967280 }
 0x6fe   :  { %2739 = dma.done.wait [#allocation13], 32  }
 0x6ff   :  { %2740 = vsyncadd [#allocation13], 4294967264 }
 0x700   :  { %1916 = vsyncpa [#allocation7], 1 }
 0x701   :  { %1917 = vsyncpa [#allocation10], 1 }
 0x702   :  { %1918 = vsyncpa [#allocation8], 1 }
 0x703   :  { %1919 = vsyncpa [#allocation13], 1 }

</bundles_post_ra>
